<compile_context>
chip_gen: v7x
topology: tpu7x:2x2x1
jax: 0.10.0
libtpu: 0.0.40
codegen_flags: <defaults>
</compile_context>

<pallas_src>
import functools

import jax
import jax.numpy as jnp
from jax.experimental import pallas as pl
from jax.experimental.pallas import tpu as pltpu

EPS = 1e-5  # torch.nn.InstanceNorm2d default eps

K_STRUCTURE = [(4, 4), (4, 4), (4, 4), (3, 4), (1, 1)]
S_STRUCTURE = [(2, 2), (2, 2), (2, 2), (1, 2), (1, 1)]
C_STRUCTURE = [8, 16, 32, 16, 1]
P_STRUCTURE = [((k[0] - s[0]) // 2, (k[1] - s[1]) // 2)
               for k, s in zip(K_STRUCTURE, S_STRUCTURE)]


# ---------------------------------------------------------------------------
# Pallas kernels
# ---------------------------------------------------------------------------
def _inorm(h):
    """InstanceNorm (affine=False): per channel (sublane) over spatial (lanes)."""
    m = jnp.mean(h, axis=-1, keepdims=True)
    d = h - m
    v = jnp.mean(d * d, axis=-1, keepdims=True)      # biased variance (PyTorch)
    return d * jax.lax.rsqrt(v + EPS)


def _sigmoid(x):
    """1/(1+exp(-x)); exp and the reciprocal both go to the EUP slot.

    Inputs are InstanceNorm'd, so |x| <= sqrt(P) << 88 and exp never overflows.
    """
    return pl.reciprocal(1.0 + jnp.exp(-x), approx=True)


def _glu_kernel(w_ref, x_ref, o_ref):
    """One batch element: fused (content|gate) conv matmul + InstanceNorm + GLU.

    w_ref : (2*outC, K) bf16   -- rows [0:outC)=content, [outC:2outC)=gate
    x_ref : (1, K, P)   bf16   -- im2col patches, P = OH*OW on the lane axis
    o_ref : (1, outC, P) bf16  -- flattened-NCHW layer output
    """
    outC = o_ref.shape[1]
    h = jnp.dot(w_ref[...], x_ref[0], preferred_element_type=jnp.float32)  # (2outC, P) f32
    out = _inorm(h[:outC]) * _sigmoid(_inorm(h[outC:]))
    o_ref[0] = out.astype(o_ref.dtype)


def glu_layer(patches, w_fused, outC):
    B, K, P = patches.shape
    return pl.pallas_call(
        _glu_kernel,
        out_shape=jax.ShapeDtypeStruct((B, outC, P), jnp.bfloat16),
        grid=(B,),
        in_specs=[
            pl.BlockSpec((2 * outC, K), lambda b: (0, 0)),   # weights resident
            pl.BlockSpec((1, K, P), lambda b: (b, 0, 0)),
        ],
        out_specs=pl.BlockSpec((1, outC, P), lambda b: (b, 0, 0)),
        compiler_params=pltpu.CompilerParams(dimension_semantics=("parallel",)),
    )(w_fused, patches)


def _glu_head_kernel(w_ref, x_ref, wl_ref, wog_ref, c0_ref, o_ref):
    """Last GLU layer fused with the head.

    head = Linear( (conv_out(attach_style(g))).view(-1, 32) )
         = sum_{c,p} g[c,p] * wl[p] * wout_g[c] + c0      (per batch element)
    where c0 folds the (spatially constant) style contribution, bout and bl.

    w_ref   : (2*outC, K) bf16
    x_ref   : (1, K, P)   bf16   (P == 32)
    wl_ref  : (1, P)      f32    linear weight
    wog_ref : (outC, 1)   f32    conv_out weight, GLU-channel part
    c0_ref  : (1, 1, 1)   f32    per-batch constant
    o_ref   : (1, 1, 1)   f32
    """
    outC = wog_ref.shape[0]
    h = jnp.dot(w_ref[...], x_ref[0], preferred_element_type=jnp.float32)  # (2outC, P) f32
    g = _inorm(h[:outC]) * _sigmoid(_inorm(h[outC:]))                      # (outC, P) f32
    red = jnp.sum(g * wl_ref[...] * wog_ref[...], axis=(0, 1), keepdims=True)  # (1, 1)
    o_ref[0] = red + c0_ref[0]


def glu_head_layer(patches, w_fused, wl_row, wog_col, c0):
    B, K, P = patches.shape
    outC = wog_col.shape[0]
    out = pl.pallas_call(
        _glu_head_kernel,
        out_shape=jax.ShapeDtypeStruct((B, 1, 1), jnp.float32),
        grid=(B,),
        in_specs=[
            pl.BlockSpec((2 * outC, K), lambda b: (0, 0)),
            pl.BlockSpec((1, K, P), lambda b: (b, 0, 0)),
            pl.BlockSpec((1, P), lambda b: (0, 0)),
            pl.BlockSpec((outC, 1), lambda b: (0, 0)),
            pl.BlockSpec((1, 1, 1), lambda b: (b, 0, 0)),
        ],
        out_specs=pl.BlockSpec((1, 1, 1), lambda b: (b, 0, 0)),
        compiler_params=pltpu.CompilerParams(dimension_semantics=("parallel",)),
    )(w_fused, patches, wl_row, wog_col, c0)
    return out.reshape(B, 1)


# ---------------------------------------------------------------------------
# Plain-JAX glue: attach_style, im2col (transposed layout), parameter setup
# ---------------------------------------------------------------------------
def attach_style(h, style):
    """cat([style broadcast over H,W, inputs], dim=1) — NCHW."""
    B, _, H, W = h.shape
    s = jnp.broadcast_to(style[:, :, None, None],
                         (B, style.shape[1], H, W)).astype(h.dtype)
    return jnp.concatenate([s, h], axis=1)


def im2col_t(x, k, s, p):
    """NCHW -> (B, C*kh*kw, OH*OW) patches.

    K ordered (C slow, kh, kw fast) to match the flattened PyTorch conv weight
    (outC, C, kh, kw); P row-major over (OH, OW) matching NCHW flatten.
    Reshape-only (no transpose) thanks to the transposed (K, P) target layout.
    """
    B, C, H, W = x.shape
    kh, kw = k
    sh, sw = s
    ph, pw = p
    OH = (H + 2 * ph - kh) // sh + 1
    OW = (W + 2 * pw - kw) // sw + 1
    xp = jnp.pad(x, ((0, 0), (0, 0), (ph, ph), (pw, pw)))
    cols = []
    for ki in range(kh):
        for kj in range(kw):
            cols.append(xp[:, :,
                           ki: ki + (OH - 1) * sh + 1: sh,
                           kj: kj + (OW - 1) * sw + 1: sw])            # (B, C, OH, OW)
    pat = jnp.stack(cols, axis=2)                                      # (B, C, kh*kw, OH, OW)
    return pat.reshape(B, C * kh * kw, OH * OW), OH, OW


def _fuse_glu_weight(wc, wg):
    outC = wc.shape[0]
    return jnp.concatenate([wc.reshape(outC, -1),
                            wg.reshape(outC, -1)], axis=0).astype(jnp.bfloat16)


def init_params(key, style_dim, use_style=True):
    """Deterministic synthetic parameters, shapes match the PyTorch module."""
    keys = jax.random.split(key, 20)
    ki = 0
    params = {"glu": []}
    inC = 1
    for li in range(5):
        if use_style:
            inC += style_dim
        outC = C_STRUCTURE[li]
        kh, kw = K_STRUCTURE[li]
        if li == 4:
            wout = 0.1 * jax.random.normal(keys[ki], (outC, inC, kh, kw), jnp.float32); ki += 1
            bout = 0.1 * jax.random.normal(keys[ki], (outC,), jnp.float32); ki += 1
            params["conv_out"] = (wout, bout)
        else:
            wc = 0.1 * jax.random.normal(keys[ki], (outC, inC, kh, kw), jnp.float32); ki += 1
            bc = 0.1 * jax.random.normal(keys[ki], (outC,), jnp.float32); ki += 1
            wg = 0.1 * jax.random.normal(keys[ki], (outC, inC, kh, kw), jnp.float32); ki += 1
            bg = 0.1 * jax.random.normal(keys[ki], (outC,), jnp.float32); ki += 1
            # bc / bg are kept for module fidelity but are mathematically inert:
            # InstanceNorm(affine=False) cancels per-channel constant shifts.
            params["glu"].append((wc, bc, wg, bg))
            inC = outC
    wl = 0.1 * jax.random.normal(keys[ki], (1, 32), jnp.float32); ki += 1
    bl = 0.1 * jax.random.normal(keys[ki], (1,), jnp.float32)
    params["linear"] = (wl, bl)
    return params


def discriminator_forward(x, style, params, vae_type="VAE1"):
    use_style = vae_type in ("VAE1", "VAE2", "VAE3")
    style_dim = style.shape[1]

    h = x.astype(jnp.bfloat16)                     # NCHW, bf16 matmul operands
    s16 = style.astype(jnp.bfloat16)

    # First three Conv2d_GLU layers (Dropout(0.1) is identity in eval mode).
    for li in range(3):
        wc, _, wg, _ = params["glu"][li]
        if use_style:
            h = attach_style(h, s16)
        patches, OH, OW = im2col_t(h, K_STRUCTURE[li], S_STRUCTURE[li], P_STRUCTURE[li])
        outC = wc.shape[0]
        out = glu_layer(patches, _fuse_glu_weight(wc, wg), outC)   # (B, outC, OH*OW)
        h = out.reshape(out.shape[0], outC, OH, OW)                # == NCHW, no transpose

    # Last GLU layer fused with attach_style + conv_out(1x1) + view(-1,32) + Linear.
    wc, _, wg, _ = params["glu"][3]
    if use_style:
        h = attach_style(h, s16)
    patches, OH, OW = im2col_t(h, K_STRUCTURE[3], S_STRUCTURE[3], P_STRUCTURE[3])
    assert OH * OW == 32, "final spatial extent must flatten to 32 (o.view(-1, 32))"

    wout, bout = params["conv_out"]                # (1, inC, 1, 1), (1,)
    wl, bl = params["linear"]                      # (1, 32), (1,)
    wflat = wout.reshape(-1)
    if use_style:
        w_s, w_g = wflat[:style_dim], wflat[style_dim:]
        s_dot = style @ w_s                        # (B,)  style is spatially constant
    else:
        w_g = wflat
        s_dot = jnp.zeros((style.shape[0],), jnp.float32)
    wl_sum = jnp.sum(wl)
    c0 = ((s_dot + bout[0]) * wl_sum + bl[0]).reshape(-1, 1, 1).astype(jnp.float32)

    wl_row = wl.astype(jnp.float32)                # (1, 32)
    wog_col = w_g.reshape(-1, 1).astype(jnp.float32)   # (16, 1)
    return glu_head_layer(patches, _fuse_glu_weight(wc, wg), wl_row, wog_col, c0)


# ---------------------------------------------------------------------------
if __name__ == "__main__":
    key = jax.random.PRNGKey(0)
    kx, ks, kp = jax.random.split(key, 3)

    B, style_dim = 2, 4
    # Input geometry implied by the module's docstring: (1, 36, 128) spectrogram.
    x = jax.random.normal(kx, (B, 1, 36, 128), dtype=jnp.float32)
    style = jax.random.normal(ks, (B, style_dim), dtype=jnp.float32)
    params = init_params(kp, style_dim, use_style=True)

    fwd = jax.jit(functools.partial(discriminator_forward, vae_type="VAE1"))
    out = jax.block_until_ready(fwd(x, style, params))
    assert out.shape == (B, 1) and out.dtype == jnp.float32
    print("KERNEL_OK")
</pallas_src>

<mosaic_0001>
module attributes {stable_mosaic.version = 11 : i64} {
  func.func @_glu_kernel(%arg0: i32, %arg1: memref<16x80xbf16, #tpu.memory_space<vmem>>, %arg2: memref<1x80x1152xbf16, #tpu.memory_space<vmem>>, %arg3: memref<1x8x1152xbf16, #tpu.memory_space<vmem>>) attributes {dimension_semantics = [#tpu.dimension_semantics<parallel>], iteration_bounds = array<i64: 2>, scalar_prefetch = 0 : i64, scratch_operands = 0 : i64, tpu.core_type = #tpu.core_type<tc>, window_params = [{pipeline_mode = #tpu.pipeline_mode<synchronous>, transform_indices = @transform_0, window_bounds = array<i64: 16, 80>}, {transform_indices = @transform_1, window_bounds = array<i64: 1, 80, 1152>}, {transform_indices = @transform_2, window_bounds = array<i64: 1, 8, 1152>}]} {
    %c0 = arith.constant 0 : index
    %c0_0 = arith.constant 0 : index
    %0 = vector.load %arg1[%c0, %c0_0] : memref<16x80xbf16, #tpu.memory_space<vmem>>, vector<16x80xbf16>
    %c0_1 = arith.constant 0 : index
    %c0_2 = arith.constant 0 : index
    %c0_3 = arith.constant 0 : index
    %1 = vector.load %arg2[%c0_1, %c0_2, %c0_3] : memref<1x80x1152xbf16, #tpu.memory_space<vmem>>, vector<1x80x1152xbf16>
    %2 = vector.shape_cast %1 : vector<1x80x1152xbf16> to vector<80x1152xbf16>
    %cst = arith.constant dense<0.000000e+00> : vector<16x1152xf32>
    %3 = tpu.matmul %0, %2, %cst {dimension_numbers = #tpu.dot_dimension_numbers<[1], [0], [0], [1], [0, 0, 1, 1], [], []>} : vector<16x80xbf16>, vector<80x1152xbf16>, vector<16x1152xf32> -> vector<16x1152xf32>
    %4 = vector.extract_strided_slice %3 {offsets = [0, 0], sizes = [8, 1152], strides = [1, 1]} : vector<16x1152xf32> to vector<8x1152xf32>
    %cst_4 = arith.constant dense<0.000000e+00> : vector<8xf32>
    %5 = vector.multi_reduction <add>, %4, %cst_4 [1] : vector<8x1152xf32> to vector<8xf32>
    %6 = vector.shape_cast %5 : vector<8xf32> to vector<8x1xf32>
    %cst_5 = arith.constant 1.152000e+03 : f32
    %7 = vector.broadcast %cst_5 : f32 to vector<8x1xf32>
    %8 = arith.divf %6, %7 : vector<8x1xf32>
    %9 = vector.broadcast %8 : vector<8x1xf32> to vector<8x1152xf32>
    %10 = arith.subf %4, %9 : vector<8x1152xf32>
    %11 = arith.mulf %10, %10 : vector<8x1152xf32>
    %cst_6 = arith.constant dense<0.000000e+00> : vector<8xf32>
    %12 = vector.multi_reduction <add>, %11, %cst_6 [1] : vector<8x1152xf32> to vector<8xf32>
    %13 = vector.shape_cast %12 : vector<8xf32> to vector<8x1xf32>
    %cst_7 = arith.constant 1.152000e+03 : f32
    %14 = vector.broadcast %cst_7 : f32 to vector<8x1xf32>
    %15 = arith.divf %13, %14 : vector<8x1xf32>
    %cst_8 = arith.constant 9.99999974E-6 : f32
    %16 = vector.broadcast %cst_8 : f32 to vector<8x1xf32>
    %17 = arith.addf %15, %16 : vector<8x1xf32>
    %18 = math.rsqrt %17 : vector<8x1xf32>
    %19 = vector.broadcast %18 : vector<8x1xf32> to vector<8x1152xf32>
    %20 = arith.mulf %10, %19 : vector<8x1152xf32>
    %21 = vector.extract_strided_slice %3 {offsets = [8, 0], sizes = [8, 1152], strides = [1, 1]} : vector<16x1152xf32> to vector<8x1152xf32>
    %cst_9 = arith.constant dense<0.000000e+00> : vector<8xf32>
    %22 = vector.multi_reduction <add>, %21, %cst_9 [1] : vector<8x1152xf32> to vector<8xf32>
    %23 = vector.shape_cast %22 : vector<8xf32> to vector<8x1xf32>
    %cst_10 = arith.constant 1.152000e+03 : f32
    %24 = vector.broadcast %cst_10 : f32 to vector<8x1xf32>
    %25 = arith.divf %23, %24 : vector<8x1xf32>
    %26 = vector.broadcast %25 : vector<8x1xf32> to vector<8x1152xf32>
    %27 = arith.subf %21, %26 : vector<8x1152xf32>
    %28 = arith.mulf %27, %27 : vector<8x1152xf32>
    %cst_11 = arith.constant dense<0.000000e+00> : vector<8xf32>
    %29 = vector.multi_reduction <add>, %28, %cst_11 [1] : vector<8x1152xf32> to vector<8xf32>
    %30 = vector.shape_cast %29 : vector<8xf32> to vector<8x1xf32>
    %cst_12 = arith.constant 1.152000e+03 : f32
    %31 = vector.broadcast %cst_12 : f32 to vector<8x1xf32>
    %32 = arith.divf %30, %31 : vector<8x1xf32>
    %cst_13 = arith.constant 9.99999974E-6 : f32
    %33 = vector.broadcast %cst_13 : f32 to vector<8x1xf32>
    %34 = arith.addf %32, %33 : vector<8x1xf32>
    %35 = math.rsqrt %34 : vector<8x1xf32>
    %36 = vector.broadcast %35 : vector<8x1xf32> to vector<8x1152xf32>
    %37 = arith.mulf %27, %36 : vector<8x1152xf32>
    %cst_14 = arith.constant 0.000000e+00 : f32
    %38 = vector.broadcast %cst_14 : f32 to vector<8x1152xf32>
    %39 = arith.subf %38, %37 : vector<8x1152xf32>
    %40 = math.exp %39 : vector<8x1152xf32>
    %cst_15 = arith.constant 1.000000e+00 : f32
    %41 = vector.broadcast %cst_15 : f32 to vector<8x1152xf32>
    %42 = arith.addf %41, %40 : vector<8x1152xf32>
    %43 = tpu.reciprocal %42 {approx = true} : vector<8x1152xf32> -> vector<8x1152xf32>
    %44 = arith.mulf %20, %43 : vector<8x1152xf32>
    %45 = arith.truncf %44 : vector<8x1152xf32> to vector<8x1152xbf16>
    %c0_16 = arith.constant 0 : index
    %c0_17 = arith.constant 0 : index
    %c0_18 = arith.constant 0 : index
    %46 = vector.load %arg3[%c0_16, %c0_17, %c0_18] : memref<1x8x1152xbf16, #tpu.memory_space<vmem>>, vector<1x8x1152xbf16>
    %47 = vector.shape_cast %46 : vector<1x8x1152xbf16> to vector<8x1152xbf16>
    %48 = vector.shape_cast %45 : vector<8x1152xbf16> to vector<1x8x1152xbf16>
    tpu.vector_store %arg3[%c0_16, %c0_17, %c0_18], %48 {strides = array<i32>} : memref<1x8x1152xbf16, #tpu.memory_space<vmem>>, vector<1x8x1152xbf16>,
    return
  }
  func.func @transform_0(%arg0: i32) -> (i32, i32) {
    %c0_i32 = arith.constant 0 : i32
    %c0_i32_0 = arith.constant 0 : i32
    %c0_i32_1 = arith.constant 0 : i32
    return %c0_i32, %c0_i32_0 : i32, i32
  }
  func.func @transform_1(%arg0: i32) -> (i32, i32, i32) {
    %c0_i32 = arith.constant 0 : i32
    %c0_i32_0 = arith.constant 0 : i32
    %c0_i32_1 = arith.constant 0 : i32
    return %arg0, %c0_i32, %c0_i32_0 : i32, i32, i32
  }
  func.func @transform_2(%arg0: i32) -> (i32, i32, i32) {
    %c0_i32 = arith.constant 0 : i32
    %c0_i32_0 = arith.constant 0 : i32
    %c0_i32_1 = arith.constant 0 : i32
    return %arg0, %c0_i32, %c0_i32_0 : i32, i32, i32
  }
}

module attributes {stable_mosaic.version = 11 : i64} {
  func.func @_glu_kernel(%arg0: i32, %arg1: memref<32x192xbf16, #tpu.memory_space<vmem>>, %arg2: memref<1x192x288xbf16, #tpu.memory_space<vmem>>, %arg3: memref<1x16x288xbf16, #tpu.memory_space<vmem>>) attributes {dimension_semantics = [#tpu.dimension_semantics<parallel>], iteration_bounds = array<i64: 2>, scalar_prefetch = 0 : i64, scratch_operands = 0 : i64, tpu.core_type = #tpu.core_type<tc>, window_params = [{pipeline_mode = #tpu.pipeline_mode<synchronous>, transform_indices = @transform_0, window_bounds = array<i64: 32, 192>}, {transform_indices = @transform_1, window_bounds = array<i64: 1, 192, 288>}, {transform_indices = @transform_2, window_bounds = array<i64: 1, 16, 288>}]} {
    %c0 = arith.constant 0 : index
    %c0_0 = arith.constant 0 : index
    %0 = vector.load %arg1[%c0, %c0_0] : memref<32x192xbf16, #tpu.memory_space<vmem>>, vector<32x192xbf16>
    %c0_1 = arith.constant 0 : index
    %c0_2 = arith.constant 0 : index
    %c0_3 = arith.constant 0 : index
    %1 = vector.load %arg2[%c0_1, %c0_2, %c0_3] : memref<1x192x288xbf16, #tpu.memory_space<vmem>>, vector<1x192x288xbf16>
    %2 = vector.shape_cast %1 : vector<1x192x288xbf16> to vector<192x288xbf16>
    %cst = arith.constant dense<0.000000e+00> : vector<32x288xf32>
    %3 = tpu.matmul %0, %2, %cst {dimension_numbers = #tpu.dot_dimension_numbers<[1], [0], [0], [1], [0, 0, 1, 1], [], []>} : vector<32x192xbf16>, vector<192x288xbf16>, vector<32x288xf32> -> vector<32x288xf32>
    %4 = vector.extract_strided_slice %3 {offsets = [0, 0], sizes = [16, 288], strides = [1, 1]} : vector<32x288xf32> to vector<16x288xf32>
    %cst_4 = arith.constant dense<0.000000e+00> : vector<16xf32>
    %5 = vector.multi_reduction <add>, %4, %cst_4 [1] : vector<16x288xf32> to vector<16xf32>
    %6 = vector.shape_cast %5 : vector<16xf32> to vector<16x1xf32>
    %cst_5 = arith.constant 2.880000e+02 : f32
    %7 = vector.broadcast %cst_5 : f32 to vector<16x1xf32>
    %8 = arith.divf %6, %7 : vector<16x1xf32>
    %9 = vector.broadcast %8 : vector<16x1xf32> to vector<16x288xf32>
    %10 = arith.subf %4, %9 : vector<16x288xf32>
    %11 = arith.mulf %10, %10 : vector<16x288xf32>
    %cst_6 = arith.constant dense<0.000000e+00> : vector<16xf32>
    %12 = vector.multi_reduction <add>, %11, %cst_6 [1] : vector<16x288xf32> to vector<16xf32>
    %13 = vector.shape_cast %12 : vector<16xf32> to vector<16x1xf32>
    %cst_7 = arith.constant 2.880000e+02 : f32
    %14 = vector.broadcast %cst_7 : f32 to vector<16x1xf32>
    %15 = arith.divf %13, %14 : vector<16x1xf32>
    %cst_8 = arith.constant 9.99999974E-6 : f32
    %16 = vector.broadcast %cst_8 : f32 to vector<16x1xf32>
    %17 = arith.addf %15, %16 : vector<16x1xf32>
    %18 = math.rsqrt %17 : vector<16x1xf32>
    %19 = vector.broadcast %18 : vector<16x1xf32> to vector<16x288xf32>
    %20 = arith.mulf %10, %19 : vector<16x288xf32>
    %21 = vector.extract_strided_slice %3 {offsets = [16, 0], sizes = [16, 288], strides = [1, 1]} : vector<32x288xf32> to vector<16x288xf32>
    %cst_9 = arith.constant dense<0.000000e+00> : vector<16xf32>
    %22 = vector.multi_reduction <add>, %21, %cst_9 [1] : vector<16x288xf32> to vector<16xf32>
    %23 = vector.shape_cast %22 : vector<16xf32> to vector<16x1xf32>
    %cst_10 = arith.constant 2.880000e+02 : f32
    %24 = vector.broadcast %cst_10 : f32 to vector<16x1xf32>
    %25 = arith.divf %23, %24 : vector<16x1xf32>
    %26 = vector.broadcast %25 : vector<16x1xf32> to vector<16x288xf32>
    %27 = arith.subf %21, %26 : vector<16x288xf32>
    %28 = arith.mulf %27, %27 : vector<16x288xf32>
    %cst_11 = arith.constant dense<0.000000e+00> : vector<16xf32>
    %29 = vector.multi_reduction <add>, %28, %cst_11 [1] : vector<16x288xf32> to vector<16xf32>
    %30 = vector.shape_cast %29 : vector<16xf32> to vector<16x1xf32>
    %cst_12 = arith.constant 2.880000e+02 : f32
    %31 = vector.broadcast %cst_12 : f32 to vector<16x1xf32>
    %32 = arith.divf %30, %31 : vector<16x1xf32>
    %cst_13 = arith.constant 9.99999974E-6 : f32
    %33 = vector.broadcast %cst_13 : f32 to vector<16x1xf32>
    %34 = arith.addf %32, %33 : vector<16x1xf32>
    %35 = math.rsqrt %34 : vector<16x1xf32>
    %36 = vector.broadcast %35 : vector<16x1xf32> to vector<16x288xf32>
    %37 = arith.mulf %27, %36 : vector<16x288xf32>
    %cst_14 = arith.constant 0.000000e+00 : f32
    %38 = vector.broadcast %cst_14 : f32 to vector<16x288xf32>
    %39 = arith.subf %38, %37 : vector<16x288xf32>
    %40 = math.exp %39 : vector<16x288xf32>
    %cst_15 = arith.constant 1.000000e+00 : f32
    %41 = vector.broadcast %cst_15 : f32 to vector<16x288xf32>
    %42 = arith.addf %41, %40 : vector<16x288xf32>
    %43 = tpu.reciprocal %42 {approx = true} : vector<16x288xf32> -> vector<16x288xf32>
    %44 = arith.mulf %20, %43 : vector<16x288xf32>
    %45 = arith.truncf %44 : vector<16x288xf32> to vector<16x288xbf16>
    %c0_16 = arith.constant 0 : index
    %c0_17 = arith.constant 0 : index
    %c0_18 = arith.constant 0 : index
    %46 = vector.load %arg3[%c0_16, %c0_17, %c0_18] : memref<1x16x288xbf16, #tpu.memory_space<vmem>>, vector<1x16x288xbf16>
    %47 = vector.shape_cast %46 : vector<1x16x288xbf16> to vector<16x288xbf16>
    %48 = vector.shape_cast %45 : vector<16x288xbf16> to vector<1x16x288xbf16>
    tpu.vector_store %arg3[%c0_16, %c0_17, %c0_18], %48 {strides = array<i32>} : memref<1x16x288xbf16, #tpu.memory_space<vmem>>, vector<1x16x288xbf16>,
    return
  }
  func.func @transform_0(%arg0: i32) -> (i32, i32) {
    %c0_i32 = arith.constant 0 : i32
    %c0_i32_0 = arith.constant 0 : i32
    %c0_i32_1 = arith.constant 0 : i32
    return %c0_i32, %c0_i32_0 : i32, i32
  }
  func.func @transform_1(%arg0: i32) -> (i32, i32, i32) {
    %c0_i32 = arith.constant 0 : i32
    %c0_i32_0 = arith.constant 0 : i32
    %c0_i32_1 = arith.constant 0 : i32
    return %arg0, %c0_i32, %c0_i32_0 : i32, i32, i32
  }
  func.func @transform_2(%arg0: i32) -> (i32, i32, i32) {
    %c0_i32 = arith.constant 0 : i32
    %c0_i32_0 = arith.constant 0 : i32
    %c0_i32_1 = arith.constant 0 : i32
    return %arg0, %c0_i32, %c0_i32_0 : i32, i32, i32
  }
}

module attributes {stable_mosaic.version = 11 : i64} {
  func.func @_glu_kernel(%arg0: i32, %arg1: memref<64x320xbf16, #tpu.memory_space<vmem>>, %arg2: memref<1x320x64xbf16, #tpu.memory_space<vmem>>, %arg3: memref<1x32x64xbf16, #tpu.memory_space<vmem>>) attributes {dimension_semantics = [#tpu.dimension_semantics<parallel>], iteration_bounds = array<i64: 2>, scalar_prefetch = 0 : i64, scratch_operands = 0 : i64, tpu.core_type = #tpu.core_type<tc>, window_params = [{pipeline_mode = #tpu.pipeline_mode<synchronous>, transform_indices = @transform_0, window_bounds = array<i64: 64, 320>}, {transform_indices = @transform_1, window_bounds = array<i64: 1, 320, 64>}, {transform_indices = @transform_2, window_bounds = array<i64: 1, 32, 64>}]} {
    %c0 = arith.constant 0 : index
    %c0_0 = arith.constant 0 : index
    %0 = vector.load %arg1[%c0, %c0_0] : memref<64x320xbf16, #tpu.memory_space<vmem>>, vector<64x320xbf16>
    %c0_1 = arith.constant 0 : index
    %c0_2 = arith.constant 0 : index
    %c0_3 = arith.constant 0 : index
    %1 = vector.load %arg2[%c0_1, %c0_2, %c0_3] : memref<1x320x64xbf16, #tpu.memory_space<vmem>>, vector<1x320x64xbf16>
    %2 = vector.shape_cast %1 : vector<1x320x64xbf16> to vector<320x64xbf16>
    %cst = arith.constant dense<0.000000e+00> : vector<64x64xf32>
    %3 = tpu.matmul %0, %2, %cst {dimension_numbers = #tpu.dot_dimension_numbers<[1], [0], [0], [1], [0, 0, 1, 1], [], []>} : vector<64x320xbf16>, vector<320x64xbf16>, vector<64x64xf32> -> vector<64x64xf32>
    %4 = vector.extract_strided_slice %3 {offsets = [0, 0], sizes = [32, 64], strides = [1, 1]} : vector<64x64xf32> to vector<32x64xf32>
    %cst_4 = arith.constant dense<0.000000e+00> : vector<32xf32>
    %5 = vector.multi_reduction <add>, %4, %cst_4 [1] : vector<32x64xf32> to vector<32xf32>
    %6 = vector.shape_cast %5 : vector<32xf32> to vector<32x1xf32>
    %cst_5 = arith.constant 6.400000e+01 : f32
    %7 = vector.broadcast %cst_5 : f32 to vector<32x1xf32>
    %8 = arith.divf %6, %7 : vector<32x1xf32>
    %9 = vector.broadcast %8 : vector<32x1xf32> to vector<32x64xf32>
    %10 = arith.subf %4, %9 : vector<32x64xf32>
    %11 = arith.mulf %10, %10 : vector<32x64xf32>
    %cst_6 = arith.constant dense<0.000000e+00> : vector<32xf32>
    %12 = vector.multi_reduction <add>, %11, %cst_6 [1] : vector<32x64xf32> to vector<32xf32>
    %13 = vector.shape_cast %12 : vector<32xf32> to vector<32x1xf32>
    %cst_7 = arith.constant 6.400000e+01 : f32
    %14 = vector.broadcast %cst_7 : f32 to vector<32x1xf32>
    %15 = arith.divf %13, %14 : vector<32x1xf32>
    %cst_8 = arith.constant 9.99999974E-6 : f32
    %16 = vector.broadcast %cst_8 : f32 to vector<32x1xf32>
    %17 = arith.addf %15, %16 : vector<32x1xf32>
    %18 = math.rsqrt %17 : vector<32x1xf32>
    %19 = vector.broadcast %18 : vector<32x1xf32> to vector<32x64xf32>
    %20 = arith.mulf %10, %19 : vector<32x64xf32>
    %21 = vector.extract_strided_slice %3 {offsets = [32, 0], sizes = [32, 64], strides = [1, 1]} : vector<64x64xf32> to vector<32x64xf32>
    %cst_9 = arith.constant dense<0.000000e+00> : vector<32xf32>
    %22 = vector.multi_reduction <add>, %21, %cst_9 [1] : vector<32x64xf32> to vector<32xf32>
    %23 = vector.shape_cast %22 : vector<32xf32> to vector<32x1xf32>
    %cst_10 = arith.constant 6.400000e+01 : f32
    %24 = vector.broadcast %cst_10 : f32 to vector<32x1xf32>
    %25 = arith.divf %23, %24 : vector<32x1xf32>
    %26 = vector.broadcast %25 : vector<32x1xf32> to vector<32x64xf32>
    %27 = arith.subf %21, %26 : vector<32x64xf32>
    %28 = arith.mulf %27, %27 : vector<32x64xf32>
    %cst_11 = arith.constant dense<0.000000e+00> : vector<32xf32>
    %29 = vector.multi_reduction <add>, %28, %cst_11 [1] : vector<32x64xf32> to vector<32xf32>
    %30 = vector.shape_cast %29 : vector<32xf32> to vector<32x1xf32>
    %cst_12 = arith.constant 6.400000e+01 : f32
    %31 = vector.broadcast %cst_12 : f32 to vector<32x1xf32>
    %32 = arith.divf %30, %31 : vector<32x1xf32>
    %cst_13 = arith.constant 9.99999974E-6 : f32
    %33 = vector.broadcast %cst_13 : f32 to vector<32x1xf32>
    %34 = arith.addf %32, %33 : vector<32x1xf32>
    %35 = math.rsqrt %34 : vector<32x1xf32>
    %36 = vector.broadcast %35 : vector<32x1xf32> to vector<32x64xf32>
    %37 = arith.mulf %27, %36 : vector<32x64xf32>
    %cst_14 = arith.constant 0.000000e+00 : f32
    %38 = vector.broadcast %cst_14 : f32 to vector<32x64xf32>
    %39 = arith.subf %38, %37 : vector<32x64xf32>
    %40 = math.exp %39 : vector<32x64xf32>
    %cst_15 = arith.constant 1.000000e+00 : f32
    %41 = vector.broadcast %cst_15 : f32 to vector<32x64xf32>
    %42 = arith.addf %41, %40 : vector<32x64xf32>
    %43 = tpu.reciprocal %42 {approx = true} : vector<32x64xf32> -> vector<32x64xf32>
    %44 = arith.mulf %20, %43 : vector<32x64xf32>
    %45 = arith.truncf %44 : vector<32x64xf32> to vector<32x64xbf16>
    %c0_16 = arith.constant 0 : index
    %c0_17 = arith.constant 0 : index
    %c0_18 = arith.constant 0 : index
    %46 = vector.load %arg3[%c0_16, %c0_17, %c0_18] : memref<1x32x64xbf16, #tpu.memory_space<vmem>>, vector<1x32x64xbf16>
    %47 = vector.shape_cast %46 : vector<1x32x64xbf16> to vector<32x64xbf16>
    %48 = vector.shape_cast %45 : vector<32x64xbf16> to vector<1x32x64xbf16>
    tpu.vector_store %arg3[%c0_16, %c0_17, %c0_18], %48 {strides = array<i32>} : memref<1x32x64xbf16, #tpu.memory_space<vmem>>, vector<1x32x64xbf16>,
    return
  }
  func.func @transform_0(%arg0: i32) -> (i32, i32) {
    %c0_i32 = arith.constant 0 : i32
    %c0_i32_0 = arith.constant 0 : i32
    %c0_i32_1 = arith.constant 0 : i32
    return %c0_i32, %c0_i32_0 : i32, i32
  }
  func.func @transform_1(%arg0: i32) -> (i32, i32, i32) {
    %c0_i32 = arith.constant 0 : i32
    %c0_i32_0 = arith.constant 0 : i32
    %c0_i32_1 = arith.constant 0 : i32
    return %arg0, %c0_i32, %c0_i32_0 : i32, i32, i32
  }
  func.func @transform_2(%arg0: i32) -> (i32, i32, i32) {
    %c0_i32 = arith.constant 0 : i32
    %c0_i32_0 = arith.constant 0 : i32
    %c0_i32_1 = arith.constant 0 : i32
    return %arg0, %c0_i32, %c0_i32_0 : i32, i32, i32
  }
}

module attributes {stable_mosaic.version = 11 : i64} {
  func.func @_glu_head_kernel(%arg0: i32, %arg1: memref<32x432xbf16, #tpu.memory_space<vmem>>, %arg2: memref<1x432x32xbf16, #tpu.memory_space<vmem>>, %arg3: memref<1x32xf32, #tpu.memory_space<vmem>>, %arg4: memref<16x1xf32, #tpu.memory_space<vmem>>, %arg5: memref<1x1x1xf32, #tpu.memory_space<vmem>>, %arg6: memref<1x1x1xf32, #tpu.memory_space<vmem>>) attributes {dimension_semantics = [#tpu.dimension_semantics<parallel>], iteration_bounds = array<i64: 2>, scalar_prefetch = 0 : i64, scratch_operands = 0 : i64, tpu.core_type = #tpu.core_type<tc>, window_params = [{pipeline_mode = #tpu.pipeline_mode<synchronous>, transform_indices = @transform_0, window_bounds = array<i64: 32, 432>}, {transform_indices = @transform_1, window_bounds = array<i64: 1, 432, 32>}, {pipeline_mode = #tpu.pipeline_mode<synchronous>, transform_indices = @transform_2, window_bounds = array<i64: 1, 32>}, {pipeline_mode = #tpu.pipeline_mode<synchronous>, transform_indices = @transform_3, window_bounds = array<i64: 16, 1>}, {transform_indices = @transform_4, window_bounds = array<i64: 1, 1, 1>}, {transform_indices = @transform_5, window_bounds = array<i64: 1, 1, 1>}]} {
    %c0 = arith.constant 0 : index
    %c0_0 = arith.constant 0 : index
    %0 = vector.load %arg1[%c0, %c0_0] : memref<32x432xbf16, #tpu.memory_space<vmem>>, vector<32x432xbf16>
    %c0_1 = arith.constant 0 : index
    %c0_2 = arith.constant 0 : index
    %c0_3 = arith.constant 0 : index
    %1 = vector.load %arg2[%c0_1, %c0_2, %c0_3] : memref<1x432x32xbf16, #tpu.memory_space<vmem>>, vector<1x432x32xbf16>
    %2 = vector.shape_cast %1 : vector<1x432x32xbf16> to vector<432x32xbf16>
    %cst = arith.constant dense<0.000000e+00> : vector<32x32xf32>
    %3 = tpu.matmul %0, %2, %cst {dimension_numbers = #tpu.dot_dimension_numbers<[1], [0], [0], [1], [0, 0, 1, 1], [], []>} : vector<32x432xbf16>, vector<432x32xbf16>, vector<32x32xf32> -> vector<32x32xf32>
    %4 = vector.extract_strided_slice %3 {offsets = [0, 0], sizes = [16, 32], strides = [1, 1]} : vector<32x32xf32> to vector<16x32xf32>
    %cst_4 = arith.constant dense<0.000000e+00> : vector<16xf32>
    %5 = vector.multi_reduction <add>, %4, %cst_4 [1] : vector<16x32xf32> to vector<16xf32>
    %6 = vector.shape_cast %5 : vector<16xf32> to vector<16x1xf32>
    %cst_5 = arith.constant 3.200000e+01 : f32
    %7 = vector.broadcast %cst_5 : f32 to vector<16x1xf32>
    %8 = arith.divf %6, %7 : vector<16x1xf32>
    %9 = vector.broadcast %8 : vector<16x1xf32> to vector<16x32xf32>
    %10 = arith.subf %4, %9 : vector<16x32xf32>
    %11 = arith.mulf %10, %10 : vector<16x32xf32>
    %cst_6 = arith.constant dense<0.000000e+00> : vector<16xf32>
    %12 = vector.multi_reduction <add>, %11, %cst_6 [1] : vector<16x32xf32> to vector<16xf32>
    %13 = vector.shape_cast %12 : vector<16xf32> to vector<16x1xf32>
    %cst_7 = arith.constant 3.200000e+01 : f32
    %14 = vector.broadcast %cst_7 : f32 to vector<16x1xf32>
    %15 = arith.divf %13, %14 : vector<16x1xf32>
    %cst_8 = arith.constant 9.99999974E-6 : f32
    %16 = vector.broadcast %cst_8 : f32 to vector<16x1xf32>
    %17 = arith.addf %15, %16 : vector<16x1xf32>
    %18 = math.rsqrt %17 : vector<16x1xf32>
    %19 = vector.broadcast %18 : vector<16x1xf32> to vector<16x32xf32>
    %20 = arith.mulf %10, %19 : vector<16x32xf32>
    %21 = vector.extract_strided_slice %3 {offsets = [16, 0], sizes = [16, 32], strides = [1, 1]} : vector<32x32xf32> to vector<16x32xf32>
    %cst_9 = arith.constant dense<0.000000e+00> : vector<16xf32>
    %22 = vector.multi_reduction <add>, %21, %cst_9 [1] : vector<16x32xf32> to vector<16xf32>
    %23 = vector.shape_cast %22 : vector<16xf32> to vector<16x1xf32>
    %cst_10 = arith.constant 3.200000e+01 : f32
    %24 = vector.broadcast %cst_10 : f32 to vector<16x1xf32>
    %25 = arith.divf %23, %24 : vector<16x1xf32>
    %26 = vector.broadcast %25 : vector<16x1xf32> to vector<16x32xf32>
    %27 = arith.subf %21, %26 : vector<16x32xf32>
    %28 = arith.mulf %27, %27 : vector<16x32xf32>
    %cst_11 = arith.constant dense<0.000000e+00> : vector<16xf32>
    %29 = vector.multi_reduction <add>, %28, %cst_11 [1] : vector<16x32xf32> to vector<16xf32>
    %30 = vector.shape_cast %29 : vector<16xf32> to vector<16x1xf32>
    %cst_12 = arith.constant 3.200000e+01 : f32
    %31 = vector.broadcast %cst_12 : f32 to vector<16x1xf32>
    %32 = arith.divf %30, %31 : vector<16x1xf32>
    %cst_13 = arith.constant 9.99999974E-6 : f32
    %33 = vector.broadcast %cst_13 : f32 to vector<16x1xf32>
    %34 = arith.addf %32, %33 : vector<16x1xf32>
    %35 = math.rsqrt %34 : vector<16x1xf32>
    %36 = vector.broadcast %35 : vector<16x1xf32> to vector<16x32xf32>
    %37 = arith.mulf %27, %36 : vector<16x32xf32>
    %cst_14 = arith.constant 0.000000e+00 : f32
    %38 = vector.broadcast %cst_14 : f32 to vector<16x32xf32>
    %39 = arith.subf %38, %37 : vector<16x32xf32>
    %40 = math.exp %39 : vector<16x32xf32>
    %cst_15 = arith.constant 1.000000e+00 : f32
    %41 = vector.broadcast %cst_15 : f32 to vector<16x32xf32>
    %42 = arith.addf %41, %40 : vector<16x32xf32>
    %43 = tpu.reciprocal %42 {approx = true} : vector<16x32xf32> -> vector<16x32xf32>
    %44 = arith.mulf %20, %43 : vector<16x32xf32>
    %c0_16 = arith.constant 0 : index
    %c0_17 = arith.constant 0 : index
    %45 = vector.load %arg3[%c0_16, %c0_17] : memref<1x32xf32, #tpu.memory_space<vmem>>, vector<1x32xf32>
    %46 = vector.broadcast %45 : vector<1x32xf32> to vector<16x32xf32>
    %47 = arith.mulf %44, %46 : vector<16x32xf32>
    %c0_18 = arith.constant 0 : index
    %c0_19 = arith.constant 0 : index
    %48 = vector.load %arg4[%c0_18, %c0_19] : memref<16x1xf32, #tpu.memory_space<vmem>>, vector<16x1xf32>
    %49 = vector.broadcast %48 : vector<16x1xf32> to vector<16x32xf32>
    %50 = arith.mulf %47, %49 : vector<16x32xf32>
    %51 = vector.shape_cast %50 : vector<16x32xf32> to vector<1x16x32xf32>
    %cst_20 = arith.constant dense<0.000000e+00> : vector<1xf32>
    %52 = vector.multi_reduction <add>, %51, %cst_20 [1, 2] : vector<1x16x32xf32> to vector<1xf32>
    %53 = vector.shape_cast %52 : vector<1xf32> to vector<1x1x1xf32>
    %54 = vector.extract %53[0, 0, 0] : f32 from vector<1x1x1xf32>
    %55 = vector.broadcast %54 : f32 to vector<1x1xf32>
    %c0_21 = arith.constant 0 : index
    %c0_22 = arith.constant 0 : index
    %c0_23 = arith.constant 0 : index
    %56 = vector.load %arg5[%c0_21, %c0_22, %c0_23] : memref<1x1x1xf32, #tpu.memory_space<vmem>>, vector<1x1x1xf32>
    %57 = vector.shape_cast %56 : vector<1x1x1xf32> to vector<1x1xf32>
    %58 = arith.addf %55, %57 : vector<1x1xf32>
    %c0_24 = arith.constant 0 : index
    %c0_25 = arith.constant 0 : index
    %c0_26 = arith.constant 0 : index
    %59 = vector.load %arg6[%c0_24, %c0_25, %c0_26] : memref<1x1x1xf32, #tpu.memory_space<vmem>>, vector<1x1x1xf32>
    %60 = vector.shape_cast %59 : vector<1x1x1xf32> to vector<1x1xf32>
    %61 = vector.shape_cast %58 : vector<1x1xf32> to vector<1x1x1xf32>
    tpu.vector_store %arg6[%c0_24, %c0_25, %c0_26], %61 {strides = array<i32>} : memref<1x1x1xf32, #tpu.memory_space<vmem>>, vector<1x1x1xf32>,
    return
  }
  func.func @transform_0(%arg0: i32) -> (i32, i32) {
    %c0_i32 = arith.constant 0 : i32
    %c0_i32_0 = arith.constant 0 : i32
    %c0_i32_1 = arith.constant 0 : i32
    return %c0_i32, %c0_i32_0 : i32, i32
  }
  func.func @transform_1(%arg0: i32) -> (i32, i32, i32) {
    %c0_i32 = arith.constant 0 : i32
    %c0_i32_0 = arith.constant 0 : i32
    %c0_i32_1 = arith.constant 0 : i32
    return %arg0, %c0_i32, %c0_i32_0 : i32, i32, i32
  }
  func.func @transform_2(%arg0: i32) -> (i32, i32) {
    %c0_i32 = arith.constant 0 : i32
    %c0_i32_0 = arith.constant 0 : i32
    %c0_i32_1 = arith.constant 0 : i32
    return %c0_i32, %c0_i32_0 : i32, i32
  }
  func.func @transform_3(%arg0: i32) -> (i32, i32) {
    %c0_i32 = arith.constant 0 : i32
    %c0_i32_0 = arith.constant 0 : i32
    %c0_i32_1 = arith.constant 0 : i32
    return %c0_i32, %c0_i32_0 : i32, i32
  }
  func.func @transform_4(%arg0: i32) -> (i32, i32, i32) {
    %c0_i32 = arith.constant 0 : i32
    %c0_i32_0 = arith.constant 0 : i32
    %c0_i32_1 = arith.constant 0 : i32
    return %arg0, %c0_i32, %c0_i32_0 : i32, i32, i32
  }
  func.func @transform_5(%arg0: i32) -> (i32, i32, i32) {
    %c0_i32 = arith.constant 0 : i32
    %c0_i32_0 = arith.constant 0 : i32
    %c0_i32_1 = arith.constant 0 : i32
    return %arg0, %c0_i32, %c0_i32_0 : i32, i32, i32
  }
}

</mosaic_0001>

<bundles_post_ra>
// kernel: discriminator_forward.4
= control target key start
LH: loop header
LB: loop body
LE: loop exit
PB: predicated region body
PF: predicated region fallthrough
CT: control target
= control target key end

     0   :  { %s1138_s9 = smov 0   ;;  %s1270_s0 = inlined_call_operand.vmem [shape: bf16[16,80], index: 0, kind: input, shape index: {}]   ;;  %s1271_s1 = inlined_call_operand.vmem [shape: bf16[2,80,1152], index: 1, kind: input, shape index: {}]   ;;  %s1272_s2 = inlined_call_operand.vmem [shape: bf16[2,8,1152], index: 2, kind: output, shape index: {}]  }
   0x1 LB: > { %s903_s10 = sadd.s32 4294967295, %s1118_s9   ;;  %p907_p0 = scmp.ge.s32.totalorder %s1118_s9, 1  ;;  %s1118_s9 = sphi %s1138_s9, %s12_s9  }
   0x2   : > { %p112_p1 = scmp.lt.s32.totalorder %s1118_s9, 3 }
   0x4   : > { %p113_p2 = pnand %p907_p0, %p112_p1 }
   0x5   : > { %p134_p3 = scmp.lt.s32.totalorder (!%p113_p2), %s903_s10, 1  ;;  %v1120_v0 = vmov (!%p113_p2), 0   ;;  %v1180_v22 = vld [vmem:[%s1270_s0] sm:$0xff] (!%p113_p2)   ;;  %vm432_vm0 = vcmask (!%p113_p2), 654336   ;;  %v1121_v43 = vmov (!%p113_p2), 0.0   ;;  %vm1122_vm1 = vmmov (!%p113_p2), 0  }
   0x6   : > { %116 = sbr.rel (%p113_p2) target bundleno = 658 (0x292), region = 28  ;;  %468 = vmatprep.mubr.bf16.mxu0 (!%p113_p2), %v1120_v0  ;;  %511 = vmatprep.mubr.bf16.mxu1 (!%p113_p2), %v1120_v0 }
   0xd   : > { %s1274_s10 = smov (!%p134_p3, %s903_s10), 1 }
   0xe   : > { %s993_s11 = smul.u32 360, %s1274_s10 }
   0xf   : > { %s994_s17 = smul.u32 36, %s1274_s10 }
  0x10   : > { %s1154_s14 = scalar_lea.vmem %s1271_s1, %s993_s11 }
  0x11   : > { %v1006_v1 = vld [vmem:[%s1154_s14 + $0x4] ss:$36 sps:$4 sm:$0xff]   ;;  %v1009_v3 = vld [vmem:[%s1154_s14 + $0xc] ss:$36 sps:$4 sm:$0xff]   ;;  %v1015_v7 = vld [vmem:[%s1154_s14 + $0x54] ss:$36 sps:$4 sm:$0xff]   ;;  %s143_s20 = scalar_lea.vmem %s1272_s2, %s994_s17 }
  0x12   : > { %v1008_v2 = vld [vmem:[%s1154_s14] ss:$36 sps:$4 sm:$0xff]   ;;  %436 = vmatprep.subr.bf16.mxu0 %v1006_v1  ;;  %v1011_v4 = vld [vmem:[%s1154_s14 + $0x4c] ss:$36 sps:$4 sm:$0xff]   ;;  %479 = vmatprep.subr.bf16.mxu1 %v1009_v3  ;;  %v1017_v8 = vld [vmem:[%s1154_s14 + $0x94] ss:$36 sps:$4 sm:$0xff]  }
  0x13   : > { %437 = vmatpush1.bf16.msra.mxu0 %v1008_v2  ;;  %v1013_v5 = vld [vmem:[%s1154_s14 + $0x8] ss:$36 sps:$4 sm:$0xff]   ;;  %v1019_v9 = vld [vmem:[%s1154_s14 + $0x50] ss:$36 sps:$4 sm:$0xff]   ;;  %v1021_v11 = vld [vmem:[%s1154_s14 + $0x9c] ss:$36 sps:$4 sm:$0xff]  }
  0x14   : > { %v1014_v6 = vld [vmem:[%s1154_s14 + $0x48] ss:$36 sps:$4 sm:$0xff]   ;;  %438 = vmatprep.subr.bf16.mxu0 %v1011_v4  ;;  %480 = vmatpush1.bf16.msra.mxu1 %v1013_v5  ;;  %v1020_v10 = vld [vmem:[%s1154_s14 + $0x90] ss:$36 sps:$4 sm:$0xff]   ;;  %v1023_v12 = vld [vmem:[%s1154_s14 + $0xdc] ss:$36 sps:$4 sm:$0xff]  }
  0x15   : > { %481 = vmatprep.subr.bf16.mxu1 %v1015_v7  ;;  %v1025_v13 = vld [vmem:[%s1154_s14 + $0x98] ss:$36 sps:$4 sm:$0xff]   ;;  %v1027_v14 = vld [vmem:[%s1154_s14 + $0xe4] ss:$36 sps:$4 sm:$0xff]   ;;  %v1033_v18 = vld [vmem:[%s1154_s14 + $0x12c] ss:$36 sps:$4 sm:$0xff]  }
  0x16   : > { %v1026_v15 = vld [vmem:[%s1154_s14 + $0xd8] ss:$36 sps:$4 sm:$0xff]   ;;  %v1029_v16 = vld [vmem:[%s1154_s14 + $0x124] ss:$36 sps:$4 sm:$0xff]   ;;  %v1037_v24 = vld [vmem:[%s1154_s14 + $0x10] ss:$36 sps:$4 sm:$0xff]  }
  0x17   : > { %439 = vmatpush1.bf16.msra.mxu0 %v1014_v6  ;;  %v1031_v17 = vld [vmem:[%s1154_s14 + $0xe0] ss:$36 sps:$4 sm:$0xff]   ;;  %v1039_v20 = vld [vmem:[%s1154_s14 + $0x14] ss:$36 sps:$4 sm:$0xff]   ;;  %v1036_v21 = vld [vmem:[%s1154_s14 + $0x128] ss:$36 sps:$4 sm:$0xff]  }
  0x18   : > { %440 = vmatprep.subr.bf16.mxu0 %v1017_v8  ;;  %482 = vmatpush1.bf16.msra.mxu1 %v1019_v9  ;;  %v1032_v19 = vld [vmem:[%s1154_s14 + $0x120] ss:$36 sps:$4 sm:$0xff]   ;;  %v1043_v26 = vld [vmem:[%s1154_s14 + $0x18] ss:$36 sps:$4 sm:$0xff]   ;;  %v1057_v31 = vld [vmem:[%s1154_s14 + $0xac] ss:$36 sps:$4 sm:$0xff]  }
  0x19   : > { %483 = vmatprep.subr.bf16.mxu1 %v1021_v11  ;;  %v1045_v23 = vld [vmem:[%s1154_s14 + $0x1c] ss:$36 sps:$4 sm:$0xff]   ;;  %v1051_v27 = vld [vmem:[%s1154_s14 + $0x64] ss:$36 sps:$4 sm:$0xff]   ;;  %v1054_v33 = vld [vmem:[%s1154_s14 + $0xec] ss:$36 sps:$4 sm:$0xff]  }
  0x1a   : > { %v1042_v25 = vld [vmem:[%s1154_s14 + $0x5c] ss:$36 sps:$4 sm:$0xff]   ;;  %v1048_v29 = vld [vmem:[%s1154_s14 + $0xa4] ss:$36 sps:$4 sm:$0xff]   ;;  %v1063_v35 = vld [vmem:[%s1154_s14 + $0xf4] ss:$36 sps:$4 sm:$0xff]  }
  0x1b   : > { %441 = vmatpush1.bf16.msra.mxu0 %v1020_v10  ;;  %v1040_v28 = vld [vmem:[%s1154_s14 + $0x58] ss:$36 sps:$4 sm:$0xff]   ;;  %v1049_v30 = vld [vmem:[%s1154_s14 + $0x60] ss:$36 sps:$4 sm:$0xff]   ;;  %v1055_v34 = vld [vmem:[%s1154_s14 + $0xa8] ss:$36 sps:$4 sm:$0xff]  }
  0x1c   : > { %442 = vmatprep.subr.bf16.mxu0 %v1023_v12  ;;  %484 = vmatpush1.bf16.msra.mxu1 %v1025_v13  ;;  %v1046_v32 = vld [vmem:[%s1154_s14 + $0xa0] ss:$36 sps:$4 sm:$0xff]   ;;  %v1052_v36 = vld [vmem:[%s1154_s14 + $0xe8] ss:$36 sps:$4 sm:$0xff]   ;;  %v1060_v37 = vld [vmem:[%s1154_s14 + $0x134] ss:$36 sps:$4 sm:$0xff]  }
  0x1d   : > { %485 = vmatprep.subr.bf16.mxu1 %v1027_v14  ;;  %v1061_v38 = vld [vmem:[%s1154_s14 + $0xf0] ss:$36 sps:$4 sm:$0xff]   ;;  %v1066_v39 = vld [vmem:[%s1154_s14 + $0x13c] ss:$36 sps:$4 sm:$0xff]   ;;  %v1068_v44 = vld [vmem:[%s1154_s14 + $0x68] ss:$36 sps:$4 sm:$0xff]  }
  0x1e   : > { %v1058_v40 = vld [vmem:[%s1154_s14 + $0x130] ss:$36 sps:$4 sm:$0xff]   ;;  %v1064_v41 = vld [vmem:[%s1154_s14 + $0x138] ss:$36 sps:$4 sm:$0xff]   ;;  %v1067_v42 = vld [vmem:[%s1154_s14 + $0x20] ss:$36 sps:$4 sm:$0xff]  }
  0x1f   : > { %443 = vmatpush1.bf16.msra.mxu0 %v1026_v15  ;;  %v1069_v45 = vld [vmem:[%s1154_s14 + $0xb0] ss:$36 sps:$4 sm:$0xff]   ;;  %v1070_v46 = vld [vmem:[%s1154_s14 + $0xf8] ss:$36 sps:$4 sm:$0xff]   ;;  %v1071_v47 = vld [vmem:[%s1154_s14 + $0x140] ss:$36 sps:$4 sm:$0xff]  }
  0x20   : > { %444 = vmatprep.subr.bf16.mxu0 %v1029_v16  ;;  %486 = vmatpush1.bf16.msra.mxu1 %v1031_v17 }
  0x21   : > { %487 = vmatprep.subr.bf16.mxu1 %v1033_v18 }
  0x23   : > { %445 = vmatpush1.bf16.msra.mxu0 %v1032_v19 }
  0x24   : > { %522 = vmatprep.subr.bf16.mxu0 %v1039_v20  ;;  %488 = vmatpush1.bf16.msra.mxu1 %v1036_v21 }
  0x25   : > { %565 = vmatprep.subr.bf16.mxu1 %v1045_v23 }
  0x26   : > { %956 = vmatmul.mubr.msk.bf16.vlgmr.msra.gmra.mrb[0].mxu0 %vm432_vm0, %v1180_v22 }
  0x27   : > { %523 = vmatpush1.bf16.msra.mxu0 %v1037_v24  ;;  %554 = vmatprep.mubr.bf16.mxu0 %v1120_v0 }
  0x28   : > { %957 = vmatmul.mubr.msk.bf16.vlgmr.msra.gmra.mrb[0].mxu1 %vm432_vm0, %v1180_v22  ;;  %524 = vmatprep.subr.bf16.mxu0 %v1042_v25 }
  0x29   : > { %566 = vmatpush1.bf16.msra.mxu1 %v1043_v26  ;;  %597 = vmatprep.mubr.bf16.mxu1 %v1120_v0 }
  0x2a   : > { %567 = vmatprep.subr.bf16.mxu1 %v1051_v27 }
  0x2b   : > { %525 = vmatpush1.bf16.msra.mxu0 %v1040_v28 }
  0x2c   : > { %526 = vmatprep.subr.bf16.mxu0 %v1048_v29 }
  0x2d   : > { %568 = vmatpush1.bf16.msra.mxu1 %v1049_v30 }
  0x2e   : > { %569 = vmatprep.subr.bf16.mxu1 %v1057_v31 }
  0x2f   : > { %527 = vmatpush1.bf16.msra.mxu0 %v1046_v32 }
  0x30   : > { %528 = vmatprep.subr.bf16.mxu0 %v1054_v33 }
  0x31   : > { %570 = vmatpush1.bf16.msra.mxu1 %v1055_v34 }
  0x32   : > { %571 = vmatprep.subr.bf16.mxu1 %v1063_v35 }
  0x33   : > { %529 = vmatpush1.bf16.msra.mxu0 %v1052_v36 }
  0x34   : > { %530 = vmatprep.subr.bf16.mxu0 %v1060_v37 }
  0x35   : > { %572 = vmatpush1.bf16.msra.mxu1 %v1061_v38 }
  0x36   : > { %573 = vmatprep.subr.bf16.mxu1 %v1066_v39 }
  0x37   : > { %531 = vmatpush1.bf16.msra.mxu0 %v1058_v40 }
  0x38   : > { %979 = vmatprep.subr.bf16.mxu0 %v1121_v43 }
  0x39   : > { %574 = vmatpush1.bf16.msra.mxu1 %v1064_v41 }
  0x3a   : > { %958 = vmatmul.mubr.msk.bf16.vlgmr.msra.gmra.mrb[4].mxu0 %vm432_vm0, %v1180_v22 }
  0x3b   : > { %980 = vmatpush3.bf16.msra.mxu0 %v1067_v42  ;;  %989 = vmatprep.mubr.msk.bf16.mxu0 %vm1122_vm1, %v1121_v43 }
  0x3c   : > { %959 = vmatmul.mubr.msk.bf16.vlgmr.msra.gmra.mrb[4].mxu1 %vm432_vm0, %v1180_v22  ;;  %981 = vmatprep.subr.bf16.mxu0 %v1121_v43 }
  0x3f   : > { %982 = vmatpush3.bf16.msra.mxu0 %v1068_v44 }
  0x40   : > { %983 = vmatprep.subr.bf16.mxu0 %v1121_v43 }
  0x43   : > { %984 = vmatpush3.bf16.msra.mxu0 %v1069_v45 }
  0x44   : > { %985 = vmatprep.subr.bf16.mxu0 %v1121_v43 }
  0x47   : > { %986 = vmatpush3.bf16.msra.mxu0 %v1070_v46 }
  0x48   : > { %987 = vmatprep.subr.bf16.mxu0 %v1121_v43 }
  0x4b   : > { %988 = vmatpush3.bf16.msra.mxu0 %v1071_v47 }
  0x4e   : > { %990 = vmatmul.mubr.msk.bf16.vlgmr.msra.gmra.mrb[8].mxu0 %vm432_vm0, %v1180_v22 }
  0xf9   : > { %v470_v48 = vpop.f32.mrb[0].mxu0 }
  0xfa   : > { %v472_v49 = vpop.f32.mrb[1].mxu0 }
  0xfb   : > { %v649_v50 = vadd.f32 %v472_v49, %v470_v48  ;;  %v474_v51 = vpop.f32.mrb[2].mxu0  ;;  %v513_v52 = vpop.f32.mrb[0].mxu1 }
  0xfc   : > { %v476_v53 = vpop.f32.mrb[3].mxu0  ;;  %v515_v54 = vpop.f32.mrb[1].mxu1 }
  0xfd   : > { %v701_v55 = vadd.f32 %v476_v53, %v474_v51  ;;  %v650_v56 = vadd.f32 %v649_v50, %v513_v52  ;;  %v517_v57 = vpop.f32.mrb[2].mxu1 }
  0xfe   : > { %v519_v58 = vpop.f32.mrb[3].mxu1 }
  0xff   : > { %v651_v59 = vadd.f32 %v650_v56, %v515_v54  ;;  %v702_v60 = vadd.f32 %v701_v55, %v517_v57 }
 0x101   : > { %v703_v61 = vadd.f32 %v702_v60, %v519_v58 }
 0x10d   : > { %v556_v62 = vpop.f32.mrb[4].mxu0 }
 0x10e   : > { %v652_v63 = vadd.f32 %v651_v59, %v556_v62  ;;  %v558_v0 = vpop.f32.mrb[5].mxu0 }
 0x10f   : > { %v560_v1 = vpop.f32.mrb[6].mxu0  ;;  %v599_v2 = vpop.f32.mrb[4].mxu1 }
 0x110   : > { %v653_v3 = vadd.f32 %v652_v63, %v558_v0  ;;  %v704_v4 = vadd.f32 %v703_v61, %v560_v1  ;;  %v562_v5 = vpop.f32.mrb[7].mxu0  ;;  %v601_v6 = vpop.f32.mrb[5].mxu1 }
 0x111   : > { %v603_v7 = vpop.f32.mrb[6].mxu1 }
 0x112   : > { %v705_v8 = vadd.f32 %v704_v4, %v562_v5  ;;  %v654_v9 = vadd.f32 %v653_v3, %v599_v2  ;;  %v605_v10 = vpop.f32.mrb[7].mxu1 }
 0x114   : > { %v655_v11 = vadd.f32 %v654_v9, %v601_v6  ;;  %v706_v12 = vadd.f32 %v705_v8, %v603_v7 }
 0x116   : > { %v707_v13 = vadd.f32 %v706_v12, %v605_v10 }
 0x121   : > { %v642_v14 = vpop.f32.mrb[8].mxu0 }
 0x122   : > { %v991_v15 = vpop.f32.mrb[9].mxu0  ;;  %v656_v16 = vadd.f32 %v655_v11, %v642_v14 }
 0x123   : > { %v645_v17 = vpop.f32.mrb[10].mxu0 }
 0x124   : > { %v992_v18 = vpop.f32.mrb[11].mxu0  ;;  %v708_v19 = vadd.f32 %v707_v13, %v645_v17 }
 0x126   : > { %709 = vadd.xlane.f32.xlu0 %v708_v19 }
 0x12a   : > { %657 = vadd.xlane.f32.xlu0 %v656_v16 }
 0x1b3   : > { %v710_v20 = vpop.xlane.xlu0 %709 }
 0x1b4   : > { %v711_v21 = vmul.f32 0.00086805556, %v710_v20 }
 0x1b6   : > { %v712_v22 = vsub.f32 %v474_v51, %v711_v21  ;;  %v713_v23 = vsub.f32 %v476_v53, %v711_v21  ;;  %v714_v24 = vsub.f32 %v517_v57, %v711_v21  ;;  %v715_v27 = vsub.f32 %v519_v58, %v711_v21 }
 0x1b7   : > { %v658_v25 = vpop.xlane.xlu0 %657  ;;  %v716_v30 = vsub.f32 %v560_v1, %v711_v21  ;;  %v717_v33 = vsub.f32 %v562_v5, %v711_v21  ;;  %v718_v39 = vsub.f32 %v603_v7, %v711_v21  ;;  %v719_v45 = vsub.f32 %v605_v10, %v711_v21 }
 0x1b8   : > { %v660_v26 = vmul.f32 0.00086805556, %v658_v25  ;;  %v721_v28 = vmul.f32 %v712_v22, %v712_v22  ;;  %v722_v29 = vmul.f32 %v713_v23, %v713_v23  ;;  %v723_v31 = vmul.f32 %v714_v24, %v714_v24 }
 0x1b9   : > { %v724_v36 = vmul.f32 %v715_v27, %v715_v27  ;;  %v725_v42 = vmul.f32 %v716_v30, %v716_v30  ;;  %v726_v46 = vmul.f32 %v717_v33, %v717_v33  ;;  %v720_v51 = vsub.f32 %v645_v17, %v711_v21 }
 0x1ba   : > { %v730_v32 = vadd.f32 %v722_v29, %v721_v28  ;;  %v1218_v34 = vsub.f32 %v470_v48, %v660_v26  ;;  %v1220_v35 = vsub.f32 %v472_v49, %v660_v26  ;;  %v1222_v38 = vsub.f32 %v513_v52, %v660_v26 }
 0x1bb   : > { %v1228_v44 = vsub.f32 %v515_v54, %v660_v26  ;;  %v1230_v48 = vsub.f32 %v556_v62, %v660_v26  ;;  %v727_v52 = vmul.f32 %v718_v39, %v718_v39  ;;  %v1234_v55 = vsub.f32 %v558_v0, %v660_v26 }
 0x1bc   : > { %v731_v37 = vadd.f32 %v730_v32, %v723_v31  ;;  %v670_v40 = vmul.f32 %v1218_v34, %v1218_v34  ;;  %v671_v41 = vmul.f32 %v1220_v35, %v1220_v35  ;;  %v672_v49 = vmul.f32 %v1222_v38, %v1222_v38 }
 0x1bd   : > { %v673_v56 = vmul.f32 %v1228_v44, %v1228_v44  ;;  %v728_v54 = vmul.f32 %v719_v45, %v719_v45  ;;  %v1238_v59 = vsub.f32 %v599_v2, %v660_v26  ;;  %v674_v60 = vmul.f32 %v1230_v48, %v1230_v48 }
 0x1be   : > { %v732_v43 = vadd.f32 %v731_v37, %v724_v36  ;;  %v679_v50 = vadd.f32 %v671_v41, %v670_v40  ;;  %v729_v62 = vmul.f32 %v720_v51, %v720_v51  ;;  %v1242_v1 = vsub.f32 %v601_v6, %v660_v26 }
 0x1bf   : > { %v675_v0 = vmul.f32 %v1234_v55, %v1234_v55  ;;  %v1246_v5 = vsub.f32 %v642_v14, %v660_v26  ;;  %v676_v7 = vmul.f32 %v1238_v59, %v1238_v59 }
 0x1c0   : > { %v733_v47 = vadd.f32 %v732_v43, %v725_v42  ;;  %v680_v57 = vadd.f32 %v679_v50, %v672_v49  ;;  %v677_v8 = vmul.f32 %v1242_v1, %v1242_v1 }
 0x1c1   : > { %v678_v6 = vmul.f32 %v1246_v5, %v1246_v5 }
 0x1c2   : > { %v734_v53 = vadd.f32 %v733_v47, %v726_v46  ;;  %v681_v61 = vadd.f32 %v680_v57, %v673_v56 }
 0x1c4   : > { %v735_v58 = vadd.f32 %v734_v53, %v727_v52  ;;  %v682_v3 = vadd.f32 %v681_v61, %v674_v60 }
 0x1c6   : > { %v736_v63 = vadd.f32 %v735_v58, %v728_v54  ;;  %v683_v2 = vadd.f32 %v682_v3, %v675_v0 }
 0x1c8   : > { %v737_v4 = vadd.f32 %v736_v63, %v729_v62  ;;  %v684_v9 = vadd.f32 %v683_v2, %v676_v7 }
 0x1ca   : > { %738 = vadd.xlane.f32.xlu1 %v737_v4  ;;  %v685_v10 = vadd.f32 %v684_v9, %v677_v8 }
 0x1cc   : > { %v686_v11 = vadd.f32 %v685_v10, %v678_v6 }
 0x1ce   : > { %687 = vadd.xlane.f32.xlu1 %v686_v11 }
 0x257   : > { %v739_v12 = vpop.xlane.xlu1 %738 }
 0x258   : > { %v740_v13 = vmul.f32 0.00086805556, %v739_v12 }
 0x25a   : > { %v741_v15 = vadd.f32 1e-05, %v740_v13 }
 0x25b   : > { %v688_v46 = vpop.xlane.xlu1 %687 }
 0x25c   : > { %1072 = vrsqrt.f32 %v741_v15 }
 0x266   : > { %v1073_v14 = vpop.eup %1072 }
 0x267   : > { %v743_v16 = vmul.f32 %v1073_v14, %v712_v22  ;;  %v744_v17 = vmul.f32 %v1073_v14, %v713_v23  ;;  %v745_v18 = vmul.f32 %v1073_v14, %v714_v24  ;;  %v746_v19 = vmul.f32 %v1073_v14, %v715_v27 }
 0x268   : > { %v747_v20 = vmul.f32 %v1073_v14, %v716_v30  ;;  %v748_v21 = vmul.f32 %v1073_v14, %v717_v33  ;;  %v749_v25 = vmul.f32 %v1073_v14, %v718_v39  ;;  %v750_v26 = vmul.f32 %v1073_v14, %v719_v45 }
 0x269   : > { %v751_v28 = vmul.f32 %v1073_v14, %v720_v51  ;;  %v752_v29 = vsub.f32 0.0, %v743_v16  ;;  %v753_v31 = vsub.f32 0.0, %v744_v17  ;;  %v754_v32 = vsub.f32 0.0, %v745_v18 }
 0x26a   : > { %v755_v36 = vsub.f32 0.0, %v746_v19  ;;  %v756_v37 = vsub.f32 0.0, %v747_v20  ;;  %v757_v40 = vsub.f32 0.0, %v748_v21  ;;  %v758_v41 = vsub.f32 0.0, %v749_v25 }
 0x26b   : > { %v761_v42 = vmul.f32 1.442695, %v752_v29  ;;  %v763_v43 = vmul.f32 1.442695, %v753_v31  ;;  %v759_v47 = vsub.f32 0.0, %v750_v26  ;;  %v760_v24 = vsub.f32 0.0, %v751_v28 }
 0x26c   : > { %v765_v22 = vmul.f32 1.442695, %v754_v32  ;;  %v767_v23 = vmul.f32 1.442695, %v755_v36  ;;  %v769_v27 = vmul.f32 1.442695, %v756_v37 }
 0x26d   : > { %1074 = vpow2.f32 %v761_v42  ;;  %v771_v30 = vmul.f32 1.442695, %v757_v40  ;;  %v689_v33 = vmul.f32 0.00086805556, %v688_v46  ;;  %v773_v39 = vmul.f32 1.442695, %v758_v41 }
 0x26e   : > { %1076 = vpow2.f32 %v763_v43  ;;  %v775_v45 = vmul.f32 1.442695, %v759_v47  ;;  %v777_v49 = vmul.f32 1.442695, %v760_v24 }
 0x26f   : > { %1078 = vpow2.f32 %v765_v22  ;;  %v690_v50 = vadd.f32 1e-05, %v689_v33 }
 0x270   : > { %1080 = vpow2.f32 %v767_v23 }
 0x271   : > { %1082 = vpow2.f32 %v769_v27 }
 0x272   : > { %1084 = vpow2.f32 %v771_v30 }
 0x273   : > { %1086 = vpow2.f32 %v773_v39 }
 0x274   : > { %1088 = vpow2.f32 %v775_v45 }
 0x275   : > { %1090 = vpow2.f32 %v777_v49 }
 0x276   : > { %1092 = vrsqrt.f32 %v690_v50 }
 0x277   : > { %v1075_v51 = vpop.eup %1074 }
 0x278   : > { %v1077_v52 = vpop.eup %1076  ;;  %v779_v53 = vadd.f32 1.0, %v1075_v51 }
 0x279   : > { %v1079_v56 = vpop.eup %1078  ;;  %v780_v57 = vadd.f32 1.0, %v1077_v52 }
 0x27a   : > { %v1081_v54 = vpop.eup %1080  ;;  %v781_v58 = vadd.f32 1.0, %v1079_v56  ;;  %1094 = vrcp.f32 %v779_v53 }
 0x27b   : > { %v1083_v60 = vpop.eup %1082  ;;  %v782_v61 = vadd.f32 1.0, %v1081_v54  ;;  %1096 = vrcp.f32 %v780_v57 }
 0x27c   : > { %v1085_v62 = vpop.eup %1084  ;;  %v783_v63 = vadd.f32 1.0, %v1083_v60  ;;  %1098 = vrcp.f32 %v781_v58 }
 0x27d   : > { %v1087_v0 = vpop.eup %1086  ;;  %v784_v3 = vadd.f32 1.0, %v1085_v62  ;;  %1100 = vrcp.f32 %v782_v61 }
 0x27e   : > { %v1089_v4 = vpop.eup %1088  ;;  %v785_v7 = vadd.f32 1.0, %v1087_v0  ;;  %1102 = vrcp.f32 %v783_v63 }
 0x27f   : > { %v1091_v2 = vpop.eup %1090  ;;  %v786_v8 = vadd.f32 1.0, %v1089_v4  ;;  %1104 = vrcp.f32 %v784_v3 }
 0x280   : > { %v1093_v9 = vpop.eup %1092  ;;  %v787_v6 = vadd.f32 1.0, %v1091_v2  ;;  %1106 = vrcp.f32 %v785_v7 }
 0x281   : > { %1108 = vrcp.f32 %v786_v8  ;;  %v692_v10 = vmul.f32 %v1093_v9, %v1218_v34  ;;  %v693_v12 = vmul.f32 %v1093_v9, %v1220_v35  ;;  %v694_v15 = vmul.f32 %v1093_v9, %v1222_v38 }
 0x282   : > { %1110 = vrcp.f32 %v787_v6  ;;  %v695_v17 = vmul.f32 %v1093_v9, %v1228_v44  ;;  %v696_v20 = vmul.f32 %v1093_v9, %v1230_v48  ;;  %v697_v25 = vmul.f32 %v1093_v9, %v1234_v55 }
 0x283   : > { %v698_v38 = vmul.f32 %v1093_v9, %v1238_v59  ;;  %v699_v44 = vmul.f32 %v1093_v9, %v1242_v1  ;;  %v700_v40 = vmul.f32 %v1093_v9, %v1246_v5 }
 0x284   : > { %v1095_v11 = vpop.eup %1094 }
 0x285   : > { %v1097_v13 = vpop.eup %1096  ;;  %v797_v14 = vmul.f32 %v1095_v11, %v692_v10 }
 0x286   : > { %v1099_v16 = vpop.eup %1098  ;;  %v798_v18 = vmul.f32 %v1097_v13, %v693_v12 }
 0x287   : > { %v1101_v19 = vpop.eup %1100  ;;  %v799_v21 = vmul.f32 %v1099_v16, %v694_v15 }
 0x288   : > { %v1103_v34 = vpop.eup %1102  ;;  %v800_v35 = vmul.f32 %v1101_v19, %v695_v17  ;;  %v968_v26 = vpack.c.bf16 %v798_v18, %v797_v14 }
 0x289   : > { %v1105_v28 = vpop.eup %1104  ;;  %v801_v29 = vmul.f32 %v1103_v34, %v696_v20 }
 0x28a   : > { %v1107_v31 = vpop.eup %1106  ;;  %v802_v32 = vmul.f32 %v1105_v28, %v697_v25  ;;  %v969_v36 = vpack.c.bf16 %v800_v35, %v799_v21  ;;  %843 = vst [vmem:[%s143_s20] sm:$0xff] %v968_v26 }
 0x28b   : > { %v1109_v37 = vpop.eup %1108  ;;  %v803_v48 = vmul.f32 %v1107_v31, %v698_v38 }
 0x28c   : > { %v1111_v41 = vpop.eup %1110  ;;  %v804_v42 = vmul.f32 %v1109_v37, %v699_v44  ;;  %v970_v43 = vpack.c.bf16 %v802_v32, %v801_v29  ;;  %844 = vst [vmem:[%s143_s20 + $0x8] sm:$0xff] %v969_v36 }
 0x28d   : > { %v805_v55 = vmul.f32 %v1111_v41, %v700_v40 }
 0x28e   : > { %v971_v46 = vpack.c.bf16 %v804_v42, %v803_v48  ;;  %845 = vst [vmem:[%s143_s20 + $0x10] sm:$0xff] %v970_v43 }
 0x28f   : > { %v972_v47 = vpack.c.bf16 %v805_v55, %v805_v55 }
 0x290   : > { %846 = vst [vmem:[%s143_s20 + $0x18] sm:$0xff] %v971_v46 }
 0x291   : > { %847 = vst [vmem:[%s143_s20 + $0x20] sm:$0xf] %v972_v47 }
 0x292 PF: > { %s12_s9 = sadd.s32 1, %s1118_s9  }
 0x293   : > { %p9_p4 = scmp.ge.s32.totalorder %s12_s9, 4  }
 0x295   :  { %11 = sbr.rel (!%p9_p4) target bundleno = 1 (0x1), region = 58 }

// kernel: discriminator_forward.5
= control target key start
LH: loop header
LB: loop body
LE: loop exit
PB: predicated region body
PF: predicated region fallthrough
CT: control target
= control target key end

     0   :  { %s908_s9 = smov 0   ;;  %s1033_s0 = inlined_call_operand.vmem [shape: bf16[32,192], index: 0, kind: input, shape index: {}]   ;;  %s1034_s1 = inlined_call_operand.vmem [shape: bf16[2,192,288], index: 1, kind: input, shape index: {}]   ;;  %s1035_s2 = inlined_call_operand.vmem [shape: bf16[2,16,288], index: 2, kind: output, shape index: {}]  }
   0x1 LB: > { %s726_s10 = sadd.s32 4294967295, %s890_s9   ;;  %p730_p0 = scmp.ge.s32.totalorder %s890_s9, 1  ;;  %s890_s9 = sphi %s908_s9, %s12_s9  }
   0x2   : > { %p112_p1 = scmp.lt.s32.totalorder %s890_s9, 3 }
   0x4   : > { %p113_p2 = pnand %p730_p0, %p112_p1 }
   0x5   : > { %p134_p3 = scmp.lt.s32.totalorder (!%p113_p2), %s726_s10, 1  ;;  %v892_v0 = vmov (!%p113_p2), 0   ;;  %v848_v1 = vld [vmem:[%s1033_s0 + $0x4] ss:$8 sps:$4 sm:$0xff] (!%p113_p2)   ;;  %vm407_vm0 = vcmask (!%p113_p2), 523264   ;;  %vm517_vm1 = vcmask (!%p113_p2), 261120  }
   0x6   : > { %116 = sbr.rel (%p113_p2) target bundleno = 641 (0x281), region = 28  ;;  %467 = vmatprep.subr.bf16.mxu1 (!%p113_p2), %v892_v0  ;;  %775 = vmatprep.mubr.msk.bf16.mxu1 (!%p113_p2), %vm407_vm0, %v848_v1  ;;  %v846_v38 = vld [vmem:[%s1033_s0] ss:$8 sps:$4 sm:$0xff] (!%p113_p2)   ;;  %v849_v39 = vld [vmem:[%s1033_s0 + $0x14] ss:$8 sps:$4 sm:$0xff] (!%p113_p2)   ;;  %vm667_vm2 = vcmask (!%p113_p2), 257024  }
   0x7   : > { %773 = vmatprep.mubr.msk.bf16.mxu0 (!%p113_p2), %vm407_vm0, %v848_v1  ;;  %v851_v40 = vld [vmem:[%s1033_s0 + $0x10] ss:$8 sps:$4 sm:$0xff] (!%p113_p2)  }
   0xd   : > { %s1037_s10 = smov (!%p134_p3, %s726_s10), 1 }
   0xe   : > { %s787_s13 = smul.u32 288, %s1037_s10 }
   0xf   : > { %s788_s23 = smul.u32 24, %s1037_s10 }
  0x10   : > { %s928_s16 = scalar_lea.vmem %s1034_s1, %s787_s13 }
  0x11   : > { %v798_v2 = vld [vmem:[%s928_s16 + $0x4] ss:$12 sps:$4 sm:$0xff]   ;;  %v800_v3 = vld [vmem:[%s928_s16 + $0x8] ss:$12 sps:$4 sm:$0xff]   ;;  %v801_v4 = vld [vmem:[%s928_s16] ss:$12 sps:$4 sm:$0xff]   ;;  %s143_s26 = scalar_lea.vmem %s1035_s2, %s788_s23 }
  0x12   : > { %414 = vmatprep.subr.bf16.mxu0 %v798_v2  ;;  %468 = vmatpush1.bf16.msra.mxu1 %v800_v3  ;;  %v802_v5 = vld [vmem:[%s928_s16 + $0x1c] ss:$12 sps:$4 sm:$0xff]   ;;  %v804_v6 = vld [vmem:[%s928_s16 + $0x20] ss:$12 sps:$4 sm:$0xff]   ;;  %v805_v7 = vld [vmem:[%s928_s16 + $0x18] ss:$12 sps:$4 sm:$0xff]  }
  0x13   : > { %415 = vmatpush1.bf16.msra.mxu0 %v801_v4  ;;  %469 = vmatprep.subr.bf16.mxu1 %v892_v0  ;;  %v806_v8 = vld [vmem:[%s928_s16 + $0x34] ss:$12 sps:$4 sm:$0xff]   ;;  %v808_v9 = vld [vmem:[%s928_s16 + $0x38] ss:$12 sps:$4 sm:$0xff]   ;;  %v809_v10 = vld [vmem:[%s928_s16 + $0x30] ss:$12 sps:$4 sm:$0xff]  }
  0x14   : > { %416 = vmatprep.subr.bf16.mxu0 %v802_v5  ;;  %v810_v11 = vld [vmem:[%s928_s16 + $0x4c] ss:$12 sps:$4 sm:$0xff]   ;;  %v812_v12 = vld [vmem:[%s928_s16 + $0x50] ss:$12 sps:$4 sm:$0xff]   ;;  %v813_v13 = vld [vmem:[%s928_s16 + $0x48] ss:$12 sps:$4 sm:$0xff]  }
  0x15   : > { %v814_v14 = vld [vmem:[%s928_s16 + $0x64] ss:$12 sps:$4 sm:$0xff]   ;;  %v816_v15 = vld [vmem:[%s928_s16 + $0x68] ss:$12 sps:$4 sm:$0xff]   ;;  %v817_v16 = vld [vmem:[%s928_s16 + $0x60] ss:$12 sps:$4 sm:$0xff]  }
  0x16   : > { %470 = vmatpush1.bf16.msra.mxu1 %v804_v6  ;;  %v818_v17 = vld [vmem:[%s928_s16 + $0x7c] ss:$12 sps:$4 sm:$0xff]   ;;  %v820_v18 = vld [vmem:[%s928_s16 + $0x80] ss:$12 sps:$4 sm:$0xff]   ;;  %v821_v19 = vld [vmem:[%s928_s16 + $0x78] ss:$12 sps:$4 sm:$0xff]  }
  0x17   : > { %417 = vmatpush1.bf16.msra.mxu0 %v805_v7  ;;  %471 = vmatprep.subr.bf16.mxu1 %v892_v0  ;;  %v822_v20 = vld [vmem:[%s928_s16 + $0x94] ss:$12 sps:$4 sm:$0xff]   ;;  %v824_v21 = vld [vmem:[%s928_s16 + $0x98] ss:$12 sps:$4 sm:$0xff]   ;;  %v825_v22 = vld [vmem:[%s928_s16 + $0x90] ss:$12 sps:$4 sm:$0xff]  }
  0x18   : > { %418 = vmatprep.subr.bf16.mxu0 %v806_v8  ;;  %v826_v23 = vld [vmem:[%s928_s16 + $0xac] ss:$12 sps:$4 sm:$0xff]   ;;  %v828_v24 = vld [vmem:[%s928_s16 + $0xb0] ss:$12 sps:$4 sm:$0xff]   ;;  %v829_v25 = vld [vmem:[%s928_s16 + $0xa8] ss:$12 sps:$4 sm:$0xff]  }
  0x19   : > { %v830_v26 = vld [vmem:[%s928_s16 + $0xc4] ss:$12 sps:$4 sm:$0xff]   ;;  %v832_v27 = vld [vmem:[%s928_s16 + $0xc8] ss:$12 sps:$4 sm:$0xff]   ;;  %v833_v28 = vld [vmem:[%s928_s16 + $0xc0] ss:$12 sps:$4 sm:$0xff]  }
  0x1a   : > { %472 = vmatpush1.bf16.msra.mxu1 %v808_v9  ;;  %v834_v29 = vld [vmem:[%s928_s16 + $0xdc] ss:$12 sps:$4 sm:$0xff]   ;;  %v836_v30 = vld [vmem:[%s928_s16 + $0xe0] ss:$12 sps:$4 sm:$0xff]   ;;  %v837_v31 = vld [vmem:[%s928_s16 + $0xd8] ss:$12 sps:$4 sm:$0xff]  }
  0x1b   : > { %419 = vmatpush1.bf16.msra.mxu0 %v809_v10  ;;  %473 = vmatprep.subr.bf16.mxu1 %v892_v0  ;;  %v838_v32 = vld [vmem:[%s928_s16 + $0xf4] ss:$12 sps:$4 sm:$0xff]   ;;  %v840_v33 = vld [vmem:[%s928_s16 + $0xf8] ss:$12 sps:$4 sm:$0xff]   ;;  %v841_v34 = vld [vmem:[%s928_s16 + $0xf0] ss:$12 sps:$4 sm:$0xff]  }
  0x1c   : > { %420 = vmatprep.subr.bf16.mxu0 %v810_v11  ;;  %v842_v35 = vld [vmem:[%s928_s16 + $0x10c] ss:$12 sps:$4 sm:$0xff]   ;;  %v844_v36 = vld [vmem:[%s928_s16 + $0x110] ss:$12 sps:$4 sm:$0xff]   ;;  %v845_v37 = vld [vmem:[%s928_s16 + $0x108] ss:$12 sps:$4 sm:$0xff]  }
  0x1e   : > { %474 = vmatpush1.bf16.msra.mxu1 %v812_v12 }
  0x1f   : > { %421 = vmatpush1.bf16.msra.mxu0 %v813_v13  ;;  %475 = vmatprep.subr.bf16.mxu1 %v892_v0 }
  0x20   : > { %422 = vmatprep.subr.bf16.mxu0 %v814_v14 }
  0x22   : > { %476 = vmatpush1.bf16.msra.mxu1 %v816_v15 }
  0x23   : > { %423 = vmatpush1.bf16.msra.mxu0 %v817_v16  ;;  %477 = vmatprep.subr.bf16.mxu1 %v892_v0 }
  0x24   : > { %424 = vmatprep.subr.bf16.mxu0 %v818_v17 }
  0x26   : > { %478 = vmatpush1.bf16.msra.mxu1 %v820_v18 }
  0x27   : > { %425 = vmatpush1.bf16.msra.mxu0 %v821_v19  ;;  %479 = vmatprep.subr.bf16.mxu1 %v892_v0 }
  0x28   : > { %426 = vmatprep.subr.bf16.mxu0 %v822_v20 }
  0x2a   : > { %480 = vmatpush1.bf16.msra.mxu1 %v824_v21 }
  0x2b   : > { %427 = vmatpush1.bf16.msra.mxu0 %v825_v22  ;;  %481 = vmatprep.subr.bf16.mxu1 %v892_v0 }
  0x2c   : > { %428 = vmatprep.subr.bf16.mxu0 %v826_v23 }
  0x2e   : > { %482 = vmatpush1.bf16.msra.mxu1 %v828_v24 }
  0x2f   : > { %429 = vmatpush1.bf16.msra.mxu0 %v829_v25  ;;  %483 = vmatprep.subr.bf16.mxu1 %v892_v0 }
  0x30   : > { %430 = vmatprep.subr.bf16.mxu0 %v830_v26 }
  0x32   : > { %484 = vmatpush1.bf16.msra.mxu1 %v832_v27 }
  0x33   : > { %431 = vmatpush1.bf16.msra.mxu0 %v833_v28  ;;  %485 = vmatprep.subr.bf16.mxu1 %v892_v0 }
  0x34   : > { %432 = vmatprep.subr.bf16.mxu0 %v834_v29 }
  0x36   : > { %486 = vmatpush1.bf16.msra.mxu1 %v836_v30 }
  0x37   : > { %433 = vmatpush1.bf16.msra.mxu0 %v837_v31  ;;  %487 = vmatprep.subr.bf16.mxu1 %v892_v0 }
  0x38   : > { %434 = vmatprep.subr.bf16.mxu0 %v838_v32 }
  0x3a   : > { %488 = vmatpush1.bf16.msra.mxu1 %v840_v33 }
  0x3b   : > { %435 = vmatpush1.bf16.msra.mxu0 %v841_v34  ;;  %489 = vmatprep.subr.bf16.mxu1 %v892_v0 }
  0x3c   : > { %436 = vmatprep.subr.bf16.mxu0 %v842_v35 }
  0x3e   : > { %490 = vmatpush1.bf16.msra.mxu1 %v844_v36 }
  0x3f   : > { %437 = vmatpush1.bf16.msra.mxu0 %v845_v37 }
  0x41   : > { %500 = vmatmul.mubr.bf16.vlgmr.msra.gmra.mrb[0].mxu1 %v846_v38 }
  0x42   : > { %447 = vmatmul.mubr.bf16.vlgmr.msra.gmra.mrb[0].mxu0 %v846_v38  ;;  %776 = vmatprep.mubr.msk.bf16.mxu1 %vm407_vm0, %v849_v39 }
  0x43   : > { %774 = vmatprep.mubr.msk.bf16.mxu0 %vm407_vm0, %v849_v39 }
  0x49   : > { %508 = vmatmul.mubr.bf16.gmra.mrb[4].mxu1 %v851_v40 }
  0x4a   : > { %457 = vmatmul.mubr.bf16.gmra.mrb[4].mxu0 %v851_v40 }
 0x114   : > { %v501_v41 = vpop.f32.mrb[0].mxu1 }
 0x115   : > { %v448_v42 = vpop.f32.mrb[0].mxu0  ;;  %v503_v43 = vpop.f32.mrb[1].mxu1  ;;  %v518_v46 = vsel %vm517_vm1, %v501_v41, 0.0 }
 0x116   : > { %v450_v44 = vpop.f32.mrb[1].mxu0  ;;  %v504_v45 = vpop.f32.mrb[2].mxu1 }
 0x117   : > { %v516_v47 = vadd.f32 %v450_v44, %v448_v42  ;;  %v452_v48 = vpop.f32.mrb[2].mxu0  ;;  %v506_v49 = vpop.f32.mrb[3].mxu1  ;;  %v523_v53 = vsel %vm517_vm1, %v504_v45, 0.0 }
 0x118   : > { %v454_v50 = vpop.f32.mrb[3].mxu0 }
 0x119   : > { %v522_v51 = vadd.f32 %v454_v50, %v452_v48  ;;  %v519_v52 = vadd.f32 %v518_v46, %v516_v47 }
 0x11b   : > { %520 = vadd.xlane.f32.xlu1 %v519_v52  ;;  %v524_v54 = vadd.f32 %v523_v53, %v522_v51 }
 0x11c   : > { %v509_v55 = vpop.f32.mrb[4].mxu1 }
 0x11d   : > { %v458_v56 = vpop.f32.mrb[4].mxu0  ;;  %v511_v57 = vpop.f32.mrb[5].mxu1  ;;  %v565_v60 = vsel %vm517_vm1, %v509_v55, 0.0 }
 0x11e   : > { %v460_v58 = vpop.f32.mrb[5].mxu0  ;;  %v512_v59 = vpop.f32.mrb[6].mxu1 }
 0x11f   : > { %v564_v61 = vadd.f32 %v460_v58, %v458_v56  ;;  %v514_v62 = vpop.f32.mrb[7].mxu1  ;;  %525 = vadd.xlane.f32.xlu1 %v524_v54  ;;  %v462_v63 = vpop.f32.mrb[6].mxu0  ;;  %v570_v3 = vsel %vm517_vm1, %v512_v59, 0.0 }
 0x120   : > { %v464_v0 = vpop.f32.mrb[7].mxu0 }
 0x121   : > { %v569_v1 = vadd.f32 %v464_v0, %v462_v63  ;;  %v566_v2 = vadd.f32 %v565_v60, %v564_v61 }
 0x123   : > { %567 = vadd.xlane.f32.xlu0 %v566_v2  ;;  %v571_v4 = vadd.f32 %v570_v3, %v569_v1 }
 0x127   : > { %572 = vadd.xlane.f32.xlu0 %v571_v4 }
 0x1a8   : > { %v521_v5 = vpop.xlane.xlu1 %520 }
 0x1a9   : > { %v528_v6 = vmul.f32 0.0034722222, %v521_v5 }
 0x1ab   : > { %v992_v8 = vsub.f32 %v448_v42, %v528_v6  ;;  %v994_v9 = vsub.f32 %v450_v44, %v528_v6  ;;  %v996_v13 = vsub.f32 %v501_v41, %v528_v6 }
 0x1ac   : > { %v526_v7 = vpop.xlane.xlu1 %525 }
 0x1ad   : > { %v529_v10 = vmul.f32 0.0034722222, %v526_v7  ;;  %v536_v20 = vmul.f32 %v992_v8, %v992_v8  ;;  %v537_v21 = vmul.f32 %v994_v9, %v994_v9  ;;  %v538_v27 = vmul.f32 %v996_v13, %v996_v13 }
 0x1af   : > { %v998_v17 = vsub.f32 %v452_v48, %v529_v10  ;;  %v1000_v18 = vsub.f32 %v454_v50, %v529_v10  ;;  %v1006_v26 = vsub.f32 %v504_v45, %v529_v10  ;;  %v542_v33 = vadd.f32 %v537_v21, %v536_v20 }
 0x1b0   : > { %v568_v11 = vpop.xlane.xlu0 %567  ;;  %v543_v40 = vsel %vm517_vm1, %v538_v27, 0.0 }
 0x1b1   : > { %v574_v12 = vmul.f32 0.0034722222, %v568_v11  ;;  %v539_v34 = vmul.f32 %v998_v17, %v998_v17  ;;  %v540_v35 = vmul.f32 %v1000_v18, %v1000_v18  ;;  %v541_v41 = vmul.f32 %v1006_v26, %v1006_v26 }
 0x1b2   : > { %v544_v44 = vadd.f32 %v543_v40, %v542_v33 }
 0x1b3   : > { %v576_v14 = vsub.f32 %v458_v56, %v574_v12  ;;  %v577_v15 = vsub.f32 %v460_v58, %v574_v12  ;;  %v578_v16 = vsub.f32 %v509_v55, %v574_v12  ;;  %v547_v46 = vadd.f32 %v540_v35, %v539_v34 }
 0x1b4   : > { %v573_v19 = vpop.xlane.xlu0 %572  ;;  %v548_v47 = vsel %vm517_vm1, %v541_v41, 0.0 }
 0x1b5   : > { %v575_v22 = vmul.f32 0.0034722222, %v573_v19  ;;  %v582_v23 = vmul.f32 %v576_v14, %v576_v14  ;;  %v583_v24 = vmul.f32 %v577_v15, %v577_v15  ;;  %v584_v25 = vmul.f32 %v578_v16, %v578_v16 }
 0x1b6   : > { %v549_v48 = vadd.f32 %v548_v47, %v547_v46 }
 0x1b7   : > { %v579_v28 = vsub.f32 %v462_v63, %v575_v22  ;;  %v580_v29 = vsub.f32 %v464_v0, %v575_v22  ;;  %v581_v30 = vsub.f32 %v512_v59, %v575_v22  ;;  %v588_v31 = vadd.f32 %v583_v24, %v582_v23 }
 0x1b8   : > { %v589_v32 = vsel %vm517_vm1, %v584_v25, 0.0 }
 0x1b9   : > { %v590_v36 = vadd.f32 %v589_v32, %v588_v31  ;;  %v585_v37 = vmul.f32 %v579_v28, %v579_v28  ;;  %v586_v38 = vmul.f32 %v580_v29, %v580_v29  ;;  %v587_v39 = vmul.f32 %v581_v30, %v581_v30 }
 0x1bb   : > { %591 = vadd.xlane.f32.xlu0 %v590_v36  ;;  %v593_v42 = vadd.f32 %v586_v38, %v585_v37  ;;  %v594_v43 = vsel %vm517_vm1, %v587_v39, 0.0 }
 0x1bd   : > { %v595_v45 = vadd.f32 %v594_v43, %v593_v42 }
 0x1bf   : > { %545 = vadd.xlane.f32.xlu0 %v544_v44  ;;  %596 = vadd.xlane.f32.xlu1 %v595_v45 }
 0x1c3   : > { %550 = vadd.xlane.f32.xlu1 %v549_v48 }
 0x248   : > { %v592_v49 = vpop.xlane.xlu0 %591 }
 0x249   : > { %v598_v50 = vmul.f32 0.0034722222, %v592_v49 }
 0x24b   : > { %v600_v51 = vadd.f32 1e-05, %v598_v50 }
 0x24c   : > { %v597_v52 = vpop.xlane.xlu1 %596  ;;  %v546_v3 = vpop.xlane.xlu0 %545 }
 0x24d   : > { %852 = vrsqrt.f32 %v600_v51  ;;  %v599_v53 = vmul.f32 0.0034722222, %v597_v52  ;;  %v552_v11 = vmul.f32 0.0034722222, %v546_v3 }
 0x24f   : > { %v601_v54 = vadd.f32 1e-05, %v599_v53  ;;  %v554_v20 = vadd.f32 1e-05, %v552_v11 }
 0x250   : > { %v551_v12 = vpop.xlane.xlu1 %550 }
 0x251   : > { %854 = vrsqrt.f32 %v601_v54  ;;  %v553_v19 = vmul.f32 0.0034722222, %v551_v12 }
 0x253   : > { %v555_v21 = vadd.f32 1e-05, %v553_v19 }
 0x257   : > { %v853_v55 = vpop.eup %852 }
 0x258   : > { %v604_v56 = vmul.f32 %v853_v55, %v576_v14  ;;  %v605_v57 = vmul.f32 %v853_v55, %v577_v15  ;;  %v606_v58 = vmul.f32 %v853_v55, %v578_v16 }
 0x25a   : > { %v610_v59 = vsub.f32 0.0, %v604_v56  ;;  %v611_v60 = vsub.f32 0.0, %v605_v57  ;;  %v612_v61 = vsub.f32 0.0, %v606_v58 }
 0x25b   : > { %v855_v62 = vpop.eup %854 }
 0x25c   : > { %v616_v63 = vmul.f32 1.442695, %v610_v59  ;;  %v618_v0 = vmul.f32 1.442695, %v611_v60  ;;  %v620_v1 = vmul.f32 1.442695, %v612_v61  ;;  %v607_v2 = vmul.f32 %v855_v62, %v579_v28 }
 0x25d   : > { %v608_v4 = vmul.f32 %v855_v62, %v580_v29  ;;  %v609_v5 = vmul.f32 %v855_v62, %v581_v30 }
 0x25e   : > { %856 = vpow2.f32 %v616_v63  ;;  %v613_v6 = vsub.f32 0.0, %v607_v2 }
 0x25f   : > { %858 = vpow2.f32 %v618_v0  ;;  %v614_v7 = vsub.f32 0.0, %v608_v4  ;;  %v615_v10 = vsub.f32 0.0, %v609_v5 }
 0x260   : > { %860 = vpow2.f32 %v620_v1  ;;  %v622_v14 = vmul.f32 1.442695, %v613_v6 }
 0x261   : > { %v624_v15 = vmul.f32 1.442695, %v614_v7  ;;  %v626_v16 = vmul.f32 1.442695, %v615_v10 }
 0x262   : > { %862 = vpow2.f32 %v622_v14 }
 0x263   : > { %864 = vpow2.f32 %v624_v15 }
 0x264   : > { %866 = vpow2.f32 %v626_v16 }
 0x265   : > { %868 = vrsqrt.f32 %v554_v20 }
 0x266   : > { %870 = vrsqrt.f32 %v555_v21 }
 0x268   : > { %v857_v22 = vpop.eup %856 }
 0x269   : > { %v859_v23 = vpop.eup %858  ;;  %v628_v24 = vadd.f32 1.0, %v857_v22 }
 0x26a   : > { %v861_v25 = vpop.eup %860  ;;  %v629_v27 = vadd.f32 1.0, %v859_v23 }
 0x26b   : > { %v630_v28 = vadd.f32 1.0, %v861_v25  ;;  %872 = vrcp.f32 %v628_v24 }
 0x26c   : > { %v863_v29 = vpop.eup %862  ;;  %874 = vrcp.f32 %v629_v27 }
 0x26d   : > { %v865_v30 = vpop.eup %864  ;;  %876 = vrcp.f32 %v630_v28  ;;  %v631_v31 = vadd.f32 1.0, %v863_v29 }
 0x26e   : > { %v867_v32 = vpop.eup %866  ;;  %v632_v33 = vadd.f32 1.0, %v865_v30 }
 0x26f   : > { %v633_v34 = vadd.f32 1.0, %v867_v32  ;;  %878 = vrcp.f32 %v631_v31  ;;  %v869_v35 = vpop.eup %868 }
 0x270   : > { %880 = vrcp.f32 %v632_v33  ;;  %v871_v36 = vpop.eup %870  ;;  %v558_v37 = vmul.f32 %v869_v35, %v992_v8  ;;  %v559_v39 = vmul.f32 %v869_v35, %v994_v9  ;;  %v560_v41 = vmul.f32 %v869_v35, %v996_v13 }
 0x271   : > { %882 = vrcp.f32 %v633_v34  ;;  %v561_v46 = vmul.f32 %v871_v36, %v998_v17  ;;  %v562_v8 = vmul.f32 %v871_v36, %v1000_v18  ;;  %v563_v50 = vmul.f32 %v871_v36, %v1006_v26 }
 0x275   : > { %v873_v38 = vpop.eup %872 }
 0x276   : > { %v875_v40 = vpop.eup %874  ;;  %v640_v42 = vmul.f32 %v873_v38, %v558_v37 }
 0x277   : > { %v877_v43 = vpop.eup %876  ;;  %v641_v44 = vmul.f32 %v875_v40, %v559_v39 }
 0x278   : > { %v642_v45 = vmul.f32 %v877_v43, %v560_v41 }
 0x279   : > { %v879_v47 = vpop.eup %878  ;;  %v783_v48 = vpack.c.bf16 %v641_v44, %v640_v42 }
 0x27a   : > { %v881_v49 = vpop.eup %880  ;;  %v784_v9 = vpack.c.bf16 %v642_v45, %v642_v45  ;;  %v643_v13 = vmul.f32 %v879_v47, %v561_v46 }
 0x27b   : > { %v883_v51 = vpop.eup %882  ;;  %666 = vst [vmem:[%s143_s26] sm:$0xff] %v783_v48  ;;  %v644_v52 = vmul.f32 %v881_v49, %v562_v8 }
 0x27c   : > { %668 = vst.msk [vmem:[%s143_s26 + $0x8] sm:$0xf] %vm667_vm2, %v784_v9  ;;  %v645_v53 = vmul.f32 %v883_v51, %v563_v50 }
 0x27d   : > { %v785_v54 = vpack.c.bf16 %v644_v52, %v643_v13 }
 0x27e   : > { %v786_v55 = vpack.c.bf16 %v645_v53, %v645_v53 }
 0x27f   : > { %669 = vst [vmem:[%s143_s26 + $0xc] sm:$0xff] %v785_v54 }
 0x280   : > { %670 = vst.msk [vmem:[%s143_s26 + $0x14] sm:$0xf] %vm667_vm2, %v786_v55 }
 0x281 PF: > { %s12_s9 = sadd.s32 1, %s890_s9  }
 0x282   : > { %p9_p4 = scmp.ge.s32.totalorder %s12_s9, 4  }
 0x284   :  { %11 = sbr.rel (!%p9_p4) target bundleno = 1 (0x1), region = 58 }

// kernel: discriminator_forward.6
= control target key start
LH: loop header
LB: loop body
LE: loop exit
PB: predicated region body
PF: predicated region fallthrough
CT: control target
= control target key end

     0   :  { %s948_s9 = smov 0   ;;  %s1089_s0 = inlined_call_operand.vmem [shape: bf16[64,320], index: 0, kind: input, shape index: {}]   ;;  %s1090_s1 = inlined_call_operand.vmem [shape: bf16[2,320,64], index: 1, kind: input, shape index: {}]   ;;  %s1091_s2 = inlined_call_operand.vmem [shape: bf16[2,32,64], index: 2, kind: output, shape index: {}]  }
   0x1 LB: > { %s729_s10 = sadd.s32 4294967295, %s931_s9   ;;  %p733_p0 = scmp.ge.s32.totalorder %s931_s9, 1  ;;  %s931_s9 = sphi %s948_s9, %s12_s9  }
   0x2   : > { %p112_p1 = scmp.lt.s32.totalorder %s931_s9, 3 }
   0x4   : > { %p113_p2 = pnand %p733_p0, %p112_p1 }
   0x5   : > { %p134_p3 = scmp.lt.s32.totalorder (!%p113_p2), %s729_s10, 1  ;;  %vm381_vm0 = vcmask (!%p113_p2), 523264   ;;  %v879_v0 = vld [vmem:[%s1089_s0 + $0x4] ss:$12 sps:$4 sm:$0xff] (!%p113_p2)   ;;  %v880_v1 = vld [vmem:[%s1089_s0 + $0x8] ss:$12 sps:$4 sm:$0xff] (!%p113_p2)  }
   0x6   : > { %116 = sbr.rel (%p113_p2) target bundleno = 637 (0x27d), region = 28  ;;  %426 = vmatprep.mubr.bf16.mxu0 (!%p113_p2), %v879_v0  ;;  %840 = vmatprep.mubr.msk.bf16.mxu1 (!%p113_p2), %vm381_vm0, %v880_v1  ;;  %v881_v21 = vld [vmem:[%s1089_s0 + $0x20] ss:$12 sps:$4 sm:$0xff] (!%p113_p2)   ;;  %v888_v22 = vld [vmem:[%s1089_s0 + $0x38] ss:$12 sps:$4 sm:$0xff] (!%p113_p2)   ;;  %vm669_vm1 = vcmask (!%p113_p2), 519168  }
   0x7   : > { %v877_v24 = vld [vmem:[%s1089_s0] ss:$12 sps:$4 sm:$0xff] (!%p113_p2)   ;;  %v882_v25 = vld [vmem:[%s1089_s0 + $0x1c] ss:$12 sps:$4 sm:$0xff] (!%p113_p2)   ;;  %v884_v27 = vld [vmem:[%s1089_s0 + $0x18] ss:$12 sps:$4 sm:$0xff] (!%p113_p2)  }
   0x8   : > { %v889_v26 = vld [vmem:[%s1089_s0 + $0x50] ss:$12 sps:$4 sm:$0xff] (!%p113_p2)   ;;  %v885_v28 = vld [vmem:[%s1089_s0 + $0x34] ss:$12 sps:$4 sm:$0xff] (!%p113_p2)   ;;  %v890_v30 = vld [vmem:[%s1089_s0 + $0x4c] ss:$12 sps:$4 sm:$0xff] (!%p113_p2)  }
   0x9   : > { %v887_v29 = vld [vmem:[%s1089_s0 + $0x30] ss:$12 sps:$4 sm:$0xff] (!%p113_p2)   ;;  %v892_v31 = vld [vmem:[%s1089_s0 + $0x48] ss:$12 sps:$4 sm:$0xff] (!%p113_p2)  }
   0xd   : > { %s1093_s10 = smov (!%p134_p3, %s729_s10), 1 }
   0xe   : > { %s848_s15 = smul.u32 160, %s1093_s10  ;;  %s779_s13 = sshll.u32 %s1093_s10, 4 }
   0xf   : > { %s143_s16 = scalar_lea.vmem %s1091_s2, %s779_s13 }
  0x10   : > { %s969_s18 = scalar_lea.vmem %s1090_s1, %s848_s15 }
  0x11   : > { %v857_v2 = vld [vmem:[%s969_s18 + $0x40] sm:$0xff]   ;;  %v859_v4 = vld [vmem:[%s969_s18 + $0x48] sm:$0xff]   ;;  %v861_v6 = vld [vmem:[%s969_s18 + $0x50] sm:$0xff]  }
  0x12   : > { %v858_v3 = vld [vmem:[%s969_s18] sm:$0xff]   ;;  %784 = vmatprep.subr.bf16.mxu0 %v857_v2  ;;  %v860_v5 = vld [vmem:[%s969_s18 + $0x8] sm:$0xff]   ;;  %v862_v7 = vld [vmem:[%s969_s18 + $0x10] sm:$0xff]  }
  0x13   : > { %785 = vmatpush3.bf16.msra.mxu0 %v858_v3  ;;  %v863_v8 = vld [vmem:[%s969_s18 + $0x58] sm:$0xff]   ;;  %v867_v9 = vld [vmem:[%s969_s18 + $0x80] sm:$0xff]   ;;  %v870_v12 = vld [vmem:[%s969_s18 + $0x88] sm:$0xff]  }
  0x14   : > { %786 = vmatprep.subr.bf16.mxu0 %v859_v4  ;;  %v864_v10 = vld [vmem:[%s969_s18 + $0x18] sm:$0xff]   ;;  %v865_v11 = vld [vmem:[%s969_s18 + $0x60] sm:$0xff]   ;;  %832 = vmatprep.subr.bf16.mxu1 %v867_v9  ;;  %v868_v14 = vld [vmem:[%s969_s18 + $0x68] sm:$0xff]  }
  0x15   : > { %833 = vmatpush3.bf16.msra.mxu1 %v867_v9  ;;  %v866_v13 = vld [vmem:[%s969_s18 + $0x20] sm:$0xff]   ;;  %v873_v15 = vld [vmem:[%s969_s18 + $0x90] sm:$0xff]   ;;  %v869_v16 = vld [vmem:[%s969_s18 + $0x28] sm:$0xff]  }
  0x16   : > { %834 = vmatprep.subr.bf16.mxu1 %v870_v12  ;;  %v876_v17 = vld [vmem:[%s969_s18 + $0x98] sm:$0xff]   ;;  %v871_v18 = vld [vmem:[%s969_s18 + $0x70] sm:$0xff]  }
  0x17   : > { %787 = vmatpush3.bf16.msra.mxu0 %v860_v5  ;;  %v872_v19 = vld [vmem:[%s969_s18 + $0x30] sm:$0xff]   ;;  %v874_v20 = vld [vmem:[%s969_s18 + $0x78] sm:$0xff]  }
  0x18   : > { %788 = vmatprep.subr.bf16.mxu0 %v861_v6  ;;  %v875_v23 = vld [vmem:[%s969_s18 + $0x38] sm:$0xff]  }
  0x19   : > { %835 = vmatpush3.bf16.msra.mxu1 %v870_v12 }
  0x1a   : > { %836 = vmatprep.subr.bf16.mxu1 %v873_v15 }
  0x1b   : > { %789 = vmatpush3.bf16.msra.mxu0 %v862_v7 }
  0x1c   : > { %790 = vmatprep.subr.bf16.mxu0 %v863_v8 }
  0x1d   : > { %837 = vmatpush3.bf16.msra.mxu1 %v873_v15 }
  0x1e   : > { %838 = vmatprep.subr.bf16.mxu1 %v876_v17 }
  0x1f   : > { %791 = vmatpush3.bf16.msra.mxu0 %v864_v10 }
  0x20   : > { %792 = vmatprep.subr.bf16.mxu0 %v865_v11 }
  0x21   : > { %839 = vmatpush3.bf16.msra.mxu1 %v876_v17 }
  0x23   : > { %793 = vmatpush3.bf16.msra.mxu0 %v866_v13 }
  0x24   : > { %794 = vmatprep.subr.bf16.mxu0 %v868_v14  ;;  %841 = vmatmul.mubr.msk.bf16.vlgmr.msra.gmra.mrb[0].mxu1 %vm381_vm0, %v881_v21 }
  0x25   : > { %844 = vmatprep.mubr.msk.bf16.mxu1 %vm381_vm0, %v888_v22 }
  0x27   : > { %795 = vmatpush3.bf16.msra.mxu0 %v869_v16 }
  0x28   : > { %796 = vmatprep.subr.bf16.mxu0 %v871_v18 }
  0x2b   : > { %797 = vmatpush3.bf16.msra.mxu0 %v872_v19 }
  0x2c   : > { %798 = vmatprep.subr.bf16.mxu0 %v874_v20  ;;  %845 = vmatmul.mubr.msk.bf16.gmra.mrb[4].mxu1 %vm381_vm0, %v889_v26 }
  0x2f   : > { %799 = vmatpush3.bf16.msra.mxu0 %v875_v23 }
  0x32   : > { %427 = vmatmul.mubr.bf16.vlgmr.msra.gmra.mrb[0].mxu0 %v877_v24 }
  0x33   : > { %434 = vmatprep.mubr.bf16.mxu0 %v882_v25 }
  0x3a   : > { %435 = vmatmul.mubr.bf16.gmra.mrb[4].mxu0 %v884_v27 }
  0x3b   : > { %442 = vmatprep.mubr.bf16.mxu0 %v885_v28 }
  0x42   : > { %443 = vmatmul.mubr.bf16.gmra.mrb[8].mxu0 %v887_v29 }
  0x43   : > { %450 = vmatprep.mubr.bf16.mxu0 %v890_v30 }
  0x4a   : > { %451 = vmatmul.mubr.bf16.gmra.mrb[12].mxu0 %v892_v31 }
  0xf7   : > { %v842_v32 = vpop.f32.mrb[0].mxu1 }
  0xf8   : > { %v493_v33 = vpop.f32.mrb[1].mxu1 }
  0xf9   : > { %v843_v34 = vpop.f32.mrb[2].mxu1 }
  0xfa   : > { %v496_v35 = vpop.f32.mrb[3].mxu1 }
  0xff   : > { %v846_v40 = vpop.f32.mrb[4].mxu1 }
 0x100   : > { %v509_v42 = vpop.f32.mrb[5].mxu1 }
 0x101   : > { %v847_v45 = vpop.f32.mrb[6].mxu1 }
 0x102   : > { %v512_v46 = vpop.f32.mrb[7].mxu1 }
 0x105   : > { %v800_v36 = vpop.f32.mrb[0].mxu0 }
 0x106   : > { %v801_v37 = vpop.f32.mrb[1].mxu0 }
 0x107   : > { %v802_v38 = vadd.f32 %v801_v37, %v800_v36  ;;  %v803_v39 = vpop.f32.mrb[2].mxu0 }
 0x108   : > { %v804_v41 = vpop.f32.mrb[3].mxu0 }
 0x109   : > { %v805_v43 = vadd.f32 %v804_v41, %v803_v39  ;;  %v494_v44 = vadd.f32 %v802_v38, %v493_v33 }
 0x10b   : > { %v1024_v47 = vadd.f32 %v805_v43, %v496_v35  ;;  %v524_v10 = vsel %vm381_vm0, %v494_v44, 0.0 }
 0x10d   : > { %v806_v48 = vpop.f32.mrb[4].mxu0  ;;  %v527_v14 = vsel %vm381_vm0, %v1024_v47, 0.0 }
 0x10e   : > { %v807_v49 = vpop.f32.mrb[5].mxu0 }
 0x10f   : > { %v808_v50 = vadd.f32 %v807_v49, %v806_v48  ;;  %v809_v51 = vpop.f32.mrb[6].mxu0 }
 0x110   : > { %v810_v52 = vpop.f32.mrb[7].mxu0 }
 0x111   : > { %v811_v53 = vadd.f32 %v810_v52, %v809_v51  ;;  %v502_v54 = vadd.f32 %v842_v32, %v808_v50 }
 0x113   : > { %v1026_v55 = vadd.f32 %v843_v34, %v811_v53  ;;  %v530_v13 = vsel %vm381_vm0, %v502_v54, 0.0 }
 0x115   : > { %v812_v56 = vpop.f32.mrb[8].mxu0  ;;  %v533_v15 = vsel %vm381_vm0, %v1026_v55, 0.0 }
 0x116   : > { %v813_v57 = vpop.f32.mrb[9].mxu0 }
 0x117   : > { %v814_v58 = vadd.f32 %v813_v57, %v812_v56  ;;  %v815_v59 = vpop.f32.mrb[10].mxu0 }
 0x118   : > { %v816_v60 = vpop.f32.mrb[11].mxu0 }
 0x119   : > { %v817_v61 = vadd.f32 %v816_v60, %v815_v59  ;;  %v510_v62 = vadd.f32 %v814_v58, %v509_v42 }
 0x11b   : > { %v513_v63 = vadd.f32 %v817_v61, %v512_v46  ;;  %v577_v0 = vsel %vm381_vm0, %v510_v62, 0.0 }
 0x11c   : > { %578 = vadd.xlane.f32.xlu0 %v577_v0 }
 0x11d   : > { %v818_v1 = vpop.f32.mrb[12].mxu0  ;;  %v580_v5 = vsel %vm381_vm0, %v513_v63, 0.0 }
 0x11e   : > { %v819_v2 = vpop.f32.mrb[13].mxu0 }
 0x11f   : > { %v820_v3 = vadd.f32 %v819_v2, %v818_v1  ;;  %v821_v4 = vpop.f32.mrb[14].mxu0 }
 0x120   : > { %v822_v6 = vpop.f32.mrb[15].mxu0  ;;  %581 = vadd.xlane.f32.xlu0 %v580_v5 }
 0x121   : > { %v823_v7 = vadd.f32 %v822_v6, %v821_v4  ;;  %v518_v8 = vadd.f32 %v846_v40, %v820_v3 }
 0x123   : > { %v583_v9 = vsel %vm381_vm0, %v518_v8, 0.0  ;;  %v521_v11 = vadd.f32 %v847_v45, %v823_v7 }
 0x124   : > { %584 = vadd.xlane.f32.xlu1 %v583_v9  ;;  %525 = vadd.xlane.f32.xlu0 %v524_v10 }
 0x125   : > { %v586_v12 = vsel %vm381_vm0, %v521_v11, 0.0 }
 0x128   : > { %587 = vadd.xlane.f32.xlu1 %v586_v12  ;;  %531 = vadd.xlane.f32.xlu0 %v530_v13 }
 0x12c   : > { %528 = vadd.xlane.f32.xlu1 %v527_v14 }
 0x130   : > { %534 = vadd.xlane.f32.xlu1 %v533_v15 }
 0x1a9   : > { %v579_v16 = vpop.xlane.xlu0 %578 }
 0x1aa   : > { %v589_v17 = vmul.f32 0.015625, %v579_v16 }
 0x1ac   : > { %v593_v18 = vsub.f32 %v510_v62, %v589_v17 }
 0x1ad   : > { %v582_v19 = vpop.xlane.xlu0 %581 }
 0x1ae   : > { %v590_v20 = vmul.f32 0.015625, %v582_v19  ;;  %v597_v21 = vmul.f32 %v593_v18, %v593_v18 }
 0x1b0   : > { %v1038_v22 = vsub.f32 %v513_v63, %v590_v20  ;;  %v601_v23 = vsel %vm381_vm0, %v597_v21, 0.0 }
 0x1b1   : > { %v585_v24 = vpop.xlane.xlu1 %584  ;;  %602 = vadd.xlane.f32.xlu0 %v601_v23  ;;  %v526_v25 = vpop.xlane.xlu0 %525 }
 0x1b2   : > { %v591_v26 = vmul.f32 0.015625, %v585_v24  ;;  %v537_v27 = vmul.f32 0.015625, %v526_v25  ;;  %v598_v28 = vmul.f32 %v1038_v22, %v1038_v22 }
 0x1b4   : > { %v1043_v29 = vsub.f32 %v518_v8, %v591_v26  ;;  %v1045_v30 = vsub.f32 %v494_v44, %v537_v27  ;;  %v604_v31 = vsel %vm381_vm0, %v598_v28, 0.0 }
 0x1b5   : > { %v588_v32 = vpop.xlane.xlu1 %587  ;;  %605 = vadd.xlane.f32.xlu1 %v604_v31  ;;  %v532_v33 = vpop.xlane.xlu0 %531 }
 0x1b6   : > { %v592_v34 = vmul.f32 0.015625, %v588_v32  ;;  %v539_v35 = vmul.f32 0.015625, %v532_v33  ;;  %v599_v36 = vmul.f32 %v1043_v29, %v1043_v29  ;;  %v545_v40 = vmul.f32 %v1045_v30, %v1045_v30 }
 0x1b8   : > { %v596_v37 = vsub.f32 %v521_v11, %v592_v34  ;;  %v1050_v38 = vsub.f32 %v502_v54, %v539_v35  ;;  %v607_v39 = vsel %vm381_vm0, %v599_v36, 0.0  ;;  %v549_v46 = vsel %vm381_vm0, %v545_v40, 0.0 }
 0x1b9   : > { %v529_v41 = vpop.xlane.xlu1 %528  ;;  %608 = vadd.xlane.f32.xlu0 %v607_v39 }
 0x1ba   : > { %v538_v42 = vmul.f32 0.015625, %v529_v41  ;;  %v600_v43 = vmul.f32 %v596_v37, %v596_v37  ;;  %v547_v48 = vmul.f32 %v1050_v38, %v1050_v38 }
 0x1bc   : > { %v1056_v44 = vsub.f32 %v1024_v47, %v538_v42  ;;  %v610_v45 = vsel %vm381_vm0, %v600_v43, 0.0  ;;  %v555_v53 = vsel %vm381_vm0, %v547_v48, 0.0 }
 0x1bd   : > { %611 = vadd.xlane.f32.xlu1 %v610_v45  ;;  %v535_v49 = vpop.xlane.xlu1 %534  ;;  %550 = vadd.xlane.f32.xlu0 %v549_v46 }
 0x1be   : > { %v540_v50 = vmul.f32 0.015625, %v535_v49  ;;  %v546_v51 = vmul.f32 %v1056_v44, %v1056_v44 }
 0x1c0   : > { %v1065_v52 = vsub.f32 %v1026_v55, %v540_v50  ;;  %v552_v47 = vsel %vm381_vm0, %v546_v51, 0.0 }
 0x1c1   : > { %553 = vadd.xlane.f32.xlu1 %v552_v47  ;;  %556 = vadd.xlane.f32.xlu0 %v555_v53 }
 0x1c2   : > { %v548_v54 = vmul.f32 %v1065_v52, %v1065_v52 }
 0x1c4   : > { %v558_v56 = vsel %vm381_vm0, %v548_v54, 0.0 }
 0x1c5   : > { %559 = vadd.xlane.f32.xlu1 %v558_v56 }
 0x23e   : > { %v603_v57 = vpop.xlane.xlu0 %602 }
 0x23f   : > { %v613_v58 = vmul.f32 0.015625, %v603_v57 }
 0x241   : > { %v617_v59 = vadd.f32 1e-05, %v613_v58 }
 0x242   : > { %v606_v60 = vpop.xlane.xlu1 %605 }
 0x243   : > { %893 = vrsqrt.f32 %v617_v59  ;;  %v614_v61 = vmul.f32 0.015625, %v606_v60 }
 0x245   : > { %v618_v55 = vadd.f32 1e-05, %v614_v61 }
 0x246   : > { %v609_v62 = vpop.xlane.xlu0 %608 }
 0x247   : > { %895 = vrsqrt.f32 %v618_v55  ;;  %v615_v63 = vmul.f32 0.015625, %v609_v62 }
 0x249   : > { %v619_v0 = vadd.f32 1e-05, %v615_v63 }
 0x24a   : > { %v612_v1 = vpop.xlane.xlu1 %611  ;;  %v551_v10 = vpop.xlane.xlu0 %550 }
 0x24b   : > { %897 = vrsqrt.f32 %v619_v0  ;;  %v616_v2 = vmul.f32 0.015625, %v612_v1  ;;  %v561_v14 = vmul.f32 0.015625, %v551_v10 }
 0x24d   : > { %v894_v3 = vpop.eup %893  ;;  %v620_v4 = vadd.f32 1e-05, %v616_v2 }
 0x24e   : > { %v625_v5 = vmul.f32 %v894_v3, %v593_v18  ;;  %v554_v12 = vpop.xlane.xlu1 %553  ;;  %v565_v18 = vadd.f32 1e-05, %v561_v14  ;;  %v557_v21 = vpop.xlane.xlu0 %556 }
 0x24f   : > { %899 = vrsqrt.f32 %v620_v4  ;;  %v562_v17 = vmul.f32 0.015625, %v554_v12  ;;  %v563_v26 = vmul.f32 0.015625, %v557_v21 }
 0x250   : > { %v629_v6 = vsub.f32 0.0, %v625_v5 }
 0x251   : > { %v896_v7 = vpop.eup %895  ;;  %v566_v25 = vadd.f32 1e-05, %v562_v17 }
 0x252   : > { %v633_v8 = vmul.f32 1.442695, %v629_v6  ;;  %v626_v9 = vmul.f32 %v896_v7, %v1038_v22  ;;  %v560_v27 = vpop.xlane.xlu1 %559 }
 0x253   : > { %v564_v33 = vmul.f32 0.015625, %v560_v27 }
 0x254   : > { %901 = vpow2.f32 %v633_v8  ;;  %v630_v11 = vsub.f32 0.0, %v626_v9 }
 0x255   : > { %v898_v13 = vpop.eup %897  ;;  %v568_v36 = vadd.f32 1e-05, %v564_v33 }
 0x256   : > { %v635_v15 = vmul.f32 1.442695, %v630_v11  ;;  %v627_v16 = vmul.f32 %v898_v13, %v1043_v29  ;;  %v567_v29 = vadd.f32 1e-05, %v563_v26 }
 0x258   : > { %903 = vpow2.f32 %v635_v15  ;;  %v631_v19 = vsub.f32 0.0, %v627_v16 }
 0x259   : > { %v900_v20 = vpop.eup %899 }
 0x25a   : > { %v637_v23 = vmul.f32 1.442695, %v631_v19  ;;  %v628_v24 = vmul.f32 %v900_v20, %v596_v37 }
 0x25c   : > { %905 = vpow2.f32 %v637_v23  ;;  %v632_v22 = vsub.f32 0.0, %v628_v24 }
 0x25d   : > { %907 = vrsqrt.f32 %v565_v18 }
 0x25e   : > { %v902_v28 = vpop.eup %901  ;;  %v639_v31 = vmul.f32 1.442695, %v632_v22  ;;  %909 = vrsqrt.f32 %v566_v25 }
 0x25f   : > { %v641_v32 = vadd.f32 1.0, %v902_v28 }
 0x260   : > { %911 = vpow2.f32 %v639_v31 }
 0x261   : > { %913 = vrcp.f32 %v641_v32 }
 0x262   : > { %v904_v34 = vpop.eup %903  ;;  %915 = vrsqrt.f32 %v567_v29 }
 0x263   : > { %v642_v35 = vadd.f32 1.0, %v904_v34 }
 0x265   : > { %917 = vrcp.f32 %v642_v35 }
 0x266   : > { %v906_v37 = vpop.eup %905  ;;  %919 = vrsqrt.f32 %v568_v36 }
 0x267   : > { %v908_v39 = vpop.eup %907  ;;  %v643_v40 = vadd.f32 1.0, %v906_v37 }
 0x268   : > { %v910_v41 = vpop.eup %909  ;;  %v573_v43 = vmul.f32 %v908_v39, %v1045_v30 }
 0x269   : > { %921 = vrcp.f32 %v643_v40  ;;  %v574_v51 = vmul.f32 %v910_v41, %v1056_v44 }
 0x26a   : > { %v912_v42 = vpop.eup %911 }
 0x26b   : > { %v914_v45 = vpop.eup %913  ;;  %v644_v46 = vadd.f32 1.0, %v912_v42 }
 0x26c   : > { %v649_v48 = vmul.f32 %v914_v45, %v573_v43  ;;  %v916_v49 = vpop.eup %915 }
 0x26d   : > { %923 = vrcp.f32 %v644_v46  ;;  %v575_v30 = vmul.f32 %v916_v49, %v1050_v38 }
 0x26e   : > { %v780_v50 = vpack.c.bf16 %v649_v48, %v649_v48 }
 0x26f   : > { %v918_v47 = vpop.eup %917 }
 0x270   : > { %670 = vst.msk [vmem:[%s143_s16] sm:$0xf] %vm669_vm1, %v780_v50  ;;  %v650_v53 = vmul.f32 %v918_v47, %v574_v51  ;;  %v920_v54 = vpop.eup %919 }
 0x271   : > { %v576_v60 = vmul.f32 %v920_v54, %v1065_v52 }
 0x272   : > { %v781_v56 = vpack.c.bf16 %v650_v53, %v650_v53 }
 0x273   : > { %v922_v57 = vpop.eup %921 }
 0x274   : > { %671 = vst.msk [vmem:[%s143_s16 + $0x4] sm:$0xf] %vm669_vm1, %v781_v56  ;;  %v651_v58 = vmul.f32 %v922_v57, %v575_v30 }
 0x276   : > { %v782_v59 = vpack.c.bf16 %v651_v58, %v651_v58 }
 0x277   : > { %v924_v61 = vpop.eup %923 }
 0x278   : > { %672 = vst.msk [vmem:[%s143_s16 + $0x8] sm:$0xf] %vm669_vm1, %v782_v59  ;;  %v652_v55 = vmul.f32 %v924_v61, %v576_v60 }
 0x27a   : > { %v783_v44 = vpack.c.bf16 %v652_v55, %v652_v55 }
 0x27c   : > { %673 = vst.msk [vmem:[%s143_s16 + $0xc] sm:$0xf] %vm669_vm1, %v783_v44 }
 0x27d PF: > { %s12_s9 = sadd.s32 1, %s931_s9  }
 0x27e   : > { %p9_p4 = scmp.ge.s32.totalorder %s12_s9, 4  }
 0x280   :  { %11 = sbr.rel (!%p9_p4) target bundleno = 1 (0x1), region = 58 }

// kernel: discriminator_forward.7
= control target key start
LH: loop header
LB: loop body
LE: loop exit
PB: predicated region body
PF: predicated region fallthrough
CT: control target
= control target key end

     0   :  { %s947_s18 = smov 0   ;;  %s1059_s0 = inlined_call_operand.vmem [shape: bf16[32,432], index: 0, kind: input, shape index: {}]   ;;  %s1060_s1 = inlined_call_operand.vmem [shape: bf16[2,432,32], index: 1, kind: input, shape index: {}]   ;;  %s1061_s2 = inlined_call_operand.vmem [shape: f32[1,32], index: 2, kind: input, shape index: {}]   ;;  %s1062_s3 = inlined_call_operand.vmem [shape: f32[16,1], index: 3, kind: input, shape index: {}]   ;;  %s1063_s4 = inlined_call_operand.vmem [shape: f32[2,1,1], index: 4, kind: input, shape index: {}]   ;;  %s1064_s5 = inlined_call_operand.vmem [shape: f32[2,1,1], index: 5, kind: output, shape index: {}]  }
   0x1 LB: > { %s765_s19 = sadd.s32 4294967295, %s914_s18   ;;  %p769_p0 = scmp.ge.s32.totalorder %s914_s18, 1  ;;  %s914_s18 = sphi %s947_s18, %s15_s18  }
   0x2   : > { %p195_p1 = scmp.lt.s32.totalorder %s914_s18, 3 }
   0x4   : > { %p196_p2 = pnand %p769_p0, %p195_p1 }
   0x5   : > { %p224_p3 = scmp.lt.s32.totalorder (!%p196_p2), %s765_s19, 1  ;;  %v916_v0 = vmov (!%p196_p2), 0   ;;  %v880_v1 = vld [vmem:[%s1059_s0 + $0x4] ss:$16 sps:$4 sm:$0xff] (!%p196_p2)   ;;  %vm498_vm0 = vcmask (!%p196_p2), 392192   ;;  %vm603_vm1 = vcmask (!%p196_p2), 261120  }
   0x6   : > { %199 = sbr.rel (%p196_p2) target bundleno = 841 (0x349), region = 40  ;;  %554 = vmatprep.subr.bf16.mxu1 (!%p196_p2), %v916_v0  ;;  %851 = vset.pattern.permute.xlu0 (!%p196_p2), %v916_v0  ;;  %v885_v2 = vld [vmem:[%s1059_s0 + $0xc] ss:$16 sps:$4 sm:$0xff] (!%p196_p2)   ;;  %v878_v28 = vld [vmem:[%s1059_s0] ss:$16 sps:$4 sm:$0xff] (!%p196_p2)   ;;  %vm707_vm2 = vcmask (!%p196_p2), 0  }
   0x7   : > { %852 = vset.pattern.permute.xlu1 (!%p196_p2), %v916_v0  ;;  %537 = vmatprep.mubr.bf16.mxu0 (!%p196_p2), %v880_v1  ;;  %v886_v29 = vld [vmem:[%s1059_s0 + $0x24] ss:$16 sps:$4 sm:$0xff] (!%p196_p2)   ;;  %v888_v32 = vld [vmem:[%s1059_s0 + $0x20] ss:$16 sps:$4 sm:$0xff] (!%p196_p2)   ;;  %v883_v33 = vld [vmem:[%s1059_s0 + $0x8] ss:$16 sps:$4 sm:$0xff] (!%p196_p2)  }
   0x8   : > { %806 = vmatprep.mubr.msk.bf16.mxu1 (!%p196_p2), %vm498_vm0, %v885_v2  ;;  %v889_v34 = vld [vmem:[%s1059_s0 + $0x2c] ss:$16 sps:$4 sm:$0xff] (!%p196_p2)   ;;  %v891_v35 = vld [vmem:[%s1059_s0 + $0x28] ss:$16 sps:$4 sm:$0xff] (!%p196_p2)  }
   0xd   : > { %s1066_s19 = smov (!%p224_p3, %s765_s19), 1 }
   0xe   : > { %s839_s24 = smul.u32 216, %s1066_s19  ;;  %s231_s25 = scalar_lea.vmem %s1063_s4, %s1066_s19 }
   0xf   : > { %s234_s29 = scalar_lea.vmem %s1064_s5, %s1066_s19 }
  0x10   : > { %s971_s27 = scalar_lea.vmem %s1060_s1, %s839_s24 }
  0x11   : > { %v853_v3 = vld [vmem:[%s971_s27 + $0x80] sm:$0xff]   ;;  %v854_v4 = vld [vmem:[%s971_s27 + $0x88] sm:$0xff]   ;;  %v857_v7 = vld [vmem:[%s971_s27 + $0x90] sm:$0xff]  }
  0x12   : > { %555 = vmatpush1.bf16.msra.mxu1 %v853_v3  ;;  %v855_v5 = vld [vmem:[%s971_s27 + $0x40] sm:$0xff]   ;;  %v858_v8 = vld [vmem:[%s971_s27 + $0x48] sm:$0xff]   ;;  %v861_v10 = vld [vmem:[%s971_s27 + $0x50] sm:$0xff]  }
  0x13   : > { %556 = vmatprep.subr.bf16.mxu1 %v916_v0  ;;  %v856_v6 = vld [vmem:[%s971_s27] sm:$0xff]   ;;  %811 = vmatprep.subr.bf16.mxu0 %v855_v5  ;;  %v859_v9 = vld [vmem:[%s971_s27 + $0x8] sm:$0xff]   ;;  %v862_v11 = vld [vmem:[%s971_s27 + $0x10] sm:$0xff]  }
  0x14   : > { %812 = vmatpush3.bf16.msra.mxu0 %v856_v6  ;;  %v860_v12 = vld [vmem:[%s971_s27 + $0x98] sm:$0xff]   ;;  %v863_v14 = vld [vmem:[%s971_s27 + $0xa0] sm:$0xff]   ;;  %v866_v17 = vld [vmem:[%s971_s27 + $0xa8] sm:$0xff]  }
  0x15   : > { %813 = vmatprep.subr.bf16.mxu0 %v858_v8  ;;  %v864_v13 = vld [vmem:[%s971_s27 + $0x58] sm:$0xff]   ;;  %v867_v16 = vld [vmem:[%s971_s27 + $0x60] sm:$0xff]   ;;  %v870_v19 = vld [vmem:[%s971_s27 + $0x68] sm:$0xff]  }
  0x16   : > { %557 = vmatpush1.bf16.msra.mxu1 %v854_v4  ;;  %v865_v15 = vld [vmem:[%s971_s27 + $0x18] sm:$0xff]   ;;  %v868_v18 = vld [vmem:[%s971_s27 + $0x20] sm:$0xff]   ;;  %v869_v20 = vld [vmem:[%s971_s27 + $0xb0] sm:$0xff]  }
  0x17   : > { %558 = vmatprep.subr.bf16.mxu1 %v916_v0  ;;  %v871_v21 = vld [vmem:[%s971_s27 + $0x28] sm:$0xff]   ;;  %v873_v22 = vld [vmem:[%s971_s27 + $0x70] sm:$0xff]   ;;  %v872_v23 = vld [vmem:[%s971_s27 + $0xb8] sm:$0xff]  }
  0x18   : > { %814 = vmatpush3.bf16.msra.mxu0 %v859_v9  ;;  %v874_v24 = vld [vmem:[%s971_s27 + $0x30] sm:$0xff]   ;;  %v876_v25 = vld [vmem:[%s971_s27 + $0x78] sm:$0xff]   ;;  %v875_v27 = vld [vmem:[%s971_s27 + $0xc0] sm:$0xff]  }
  0x19   : > { %815 = vmatprep.subr.bf16.mxu0 %v861_v10  ;;  %v877_v26 = vld [vmem:[%s971_s27 + $0x38] sm:$0xff]   ;;  %v881_v30 = vld [vmem:[%s971_s27 + $0xc8] sm:$0xff]   ;;  %v882_v31 = vld [vmem:[%s971_s27 + $0xd0] sm:$0xff]  }
  0x1a   : > { %559 = vmatpush1.bf16.msra.mxu1 %v857_v7 }
  0x1b   : > { %560 = vmatprep.subr.bf16.mxu1 %v916_v0 }
  0x1c   : > { %816 = vmatpush3.bf16.msra.mxu0 %v862_v11 }
  0x1d   : > { %817 = vmatprep.subr.bf16.mxu0 %v864_v13 }
  0x1e   : > { %561 = vmatpush1.bf16.msra.mxu1 %v860_v12 }
  0x1f   : > { %562 = vmatprep.subr.bf16.mxu1 %v916_v0 }
  0x20   : > { %818 = vmatpush3.bf16.msra.mxu0 %v865_v15 }
  0x21   : > { %819 = vmatprep.subr.bf16.mxu0 %v867_v16 }
  0x22   : > { %563 = vmatpush1.bf16.msra.mxu1 %v863_v14 }
  0x23   : > { %564 = vmatprep.subr.bf16.mxu1 %v916_v0 }
  0x24   : > { %820 = vmatpush3.bf16.msra.mxu0 %v868_v18 }
  0x25   : > { %821 = vmatprep.subr.bf16.mxu0 %v870_v19 }
  0x26   : > { %565 = vmatpush1.bf16.msra.mxu1 %v866_v17 }
  0x27   : > { %566 = vmatprep.subr.bf16.mxu1 %v916_v0 }
  0x28   : > { %822 = vmatpush3.bf16.msra.mxu0 %v871_v21  ;;  %v678_v21 = vld [vmem:[%s1062_s3] sm:$0xff] }
  0x29   : > { %823 = vmatprep.subr.bf16.mxu0 %v873_v22 }
  0x2a   : > { %567 = vmatpush1.bf16.msra.mxu1 %v869_v20  ;;  %v679_v20 = vld [vmem:[%s1062_s3 + $0x8] sm:$0xff] }
  0x2b   : > { %568 = vmatprep.subr.bf16.mxu1 %v916_v0 }
  0x2c   : > { %824 = vmatpush3.bf16.msra.mxu0 %v874_v24 }
  0x2d   : > { %825 = vmatprep.subr.bf16.mxu0 %v876_v25 }
  0x2e   : > { %569 = vmatpush1.bf16.msra.mxu1 %v872_v23 }
  0x2f   : > { %570 = vmatprep.subr.bf16.mxu1 %v916_v0 }
  0x30   : > { %826 = vmatpush3.bf16.msra.mxu0 %v877_v26 }
  0x32   : > { %571 = vmatpush1.bf16.msra.mxu1 %v875_v27 }
  0x33   : > { %572 = vmatprep.subr.bf16.mxu1 %v916_v0  ;;  %538 = vmatmul.mubr.bf16.vlgmr.msra.gmra.mrb[0].mxu0 %v878_v28 }
  0x34   : > { %545 = vmatprep.mubr.bf16.mxu0 %v886_v29 }
  0x36   : > { %573 = vmatpush1.bf16.msra.mxu1 %v881_v30 }
  0x37   : > { %574 = vmatprep.subr.bf16.mxu1 %v916_v0 }
  0x3a   : > { %575 = vmatpush1.bf16.msra.mxu1 %v882_v31 }
  0x3b   : > { %546 = vmatmul.mubr.bf16.gmra.mrb[4].mxu0 %v888_v32 }
  0x3d   : > { %587 = vmatmul.mubr.bf16.vlgmr.msra.gmra.mrb[0].mxu1 %v883_v33 }
  0x3e   : > { %807 = vmatprep.mubr.msk.bf16.mxu1 %vm498_vm0, %v889_v34 }
  0x45   : > { %595 = vmatmul.mubr.bf16.gmra.mrb[4].mxu1 %v891_v35 }
 0x106   : > { %v827_v36 = vpop.f32.mrb[0].mxu0 }
 0x107   : > { %v828_v37 = vpop.f32.mrb[1].mxu0 }
 0x108   : > { %v829_v38 = vadd.f32 %v828_v37, %v827_v36  ;;  %v830_v39 = vpop.f32.mrb[2].mxu0 }
 0x109   : > { %v831_v40 = vpop.f32.mrb[3].mxu0 }
 0x10a   : > { %v832_v41 = vadd.f32 %v831_v40, %v830_v39 }
 0x10e   : > { %v833_v42 = vpop.f32.mrb[4].mxu0 }
 0x10f   : > { %v834_v44 = vpop.f32.mrb[5].mxu0 }
 0x110   : > { %v588_v43 = vpop.f32.mrb[0].mxu1  ;;  %v835_v47 = vadd.f32 %v834_v44, %v833_v42  ;;  %v836_v48 = vpop.f32.mrb[6].mxu0 }
 0x111   : > { %v589_v45 = vadd.f32 %v829_v38, %v588_v43  ;;  %v590_v46 = vpop.f32.mrb[1].mxu1  ;;  %v837_v50 = vpop.f32.mrb[7].mxu0 }
 0x112   : > { %v591_v49 = vpop.f32.mrb[2].mxu1  ;;  %v838_v54 = vadd.f32 %v837_v50, %v836_v48 }
 0x113   : > { %v592_v51 = vadd.f32 %v832_v41, %v591_v49  ;;  %v593_v52 = vpop.f32.mrb[3].mxu1  ;;  %v604_v53 = vsel %vm603_vm1, %v589_v45, 0.0 }
 0x114   : > { %605 = vadd.xlane.f32.xlu1 %v604_v53 }
 0x115   : > { %v607_v55 = vsel %vm603_vm1, %v592_v51, 0.0 }
 0x118   : > { %v596_v56 = vpop.f32.mrb[4].mxu1  ;;  %608 = vadd.xlane.f32.xlu1 %v607_v55 }
 0x119   : > { %v597_v57 = vadd.f32 %v835_v47, %v596_v56  ;;  %v598_v58 = vpop.f32.mrb[5].mxu1 }
 0x11a   : > { %v599_v59 = vpop.f32.mrb[6].mxu1 }
 0x11b   : > { %v600_v60 = vadd.f32 %v838_v54, %v599_v59  ;;  %v601_v61 = vpop.f32.mrb[7].mxu1  ;;  %v631_v62 = vsel %vm603_vm1, %v597_v57, 0.0 }
 0x11c   : > { %632 = vadd.xlane.f32.xlu0 %v631_v62 }
 0x11d   : > { %v634_v63 = vsel %vm603_vm1, %v600_v60, 0.0 }
 0x120   : > { %635 = vadd.xlane.f32.xlu0 %v634_v63 }
 0x1a1   : > { %v606_v0 = vpop.xlane.xlu1 %605 }
 0x1a2   : > { %v611_v1 = vmul.f32 0.03125, %v606_v0 }
 0x1a4   : > { %v613_v5 = vsub.f32 %v589_v45, %v611_v1 }
 0x1a5   : > { %v609_v2 = vpop.xlane.xlu1 %608 }
 0x1a6   : > { %v612_v6 = vmul.f32 0.03125, %v609_v2  ;;  %v615_v14 = vmul.f32 %v613_v5, %v613_v5 }
 0x1a8   : > { %v614_v11 = vsub.f32 %v592_v51, %v612_v6  ;;  %v617_v17 = vsel %vm603_vm1, %v615_v14, 0.0  ;;  %v808_v51 = vld [vmem:[%s1061_s2] ss:$0 sm:$0xff] }
 0x1a9   : > { %v633_v3 = vpop.xlane.xlu0 %632 }
 0x1aa   : > { %v637_v4 = vmul.f32 0.03125, %v633_v3  ;;  %v616_v18 = vmul.f32 %v614_v11, %v614_v11 }
 0x1ac   : > { %v639_v7 = vsub.f32 %v597_v57, %v637_v4  ;;  %v620_v19 = vsel %vm603_vm1, %v616_v18, 0.0 }
 0x1ad   : > { %v636_v8 = vpop.xlane.xlu0 %635 }
 0x1ae   : > { %v638_v9 = vmul.f32 0.03125, %v636_v8  ;;  %v641_v10 = vmul.f32 %v639_v7, %v639_v7 }
 0x1b0   : > { %v640_v12 = vsub.f32 %v600_v60, %v638_v9  ;;  %v643_v13 = vsel %vm603_vm1, %v641_v10, 0.0 }
 0x1b1   : > { %644 = vadd.xlane.f32.xlu0 %v643_v13 }
 0x1b2   : > { %v642_v15 = vmul.f32 %v640_v12, %v640_v12 }
 0x1b4   : > { %v646_v16 = vsel %vm603_vm1, %v642_v15, 0.0 }
 0x1b5   : > { %647 = vadd.xlane.f32.xlu1 %v646_v16  ;;  %618 = vadd.xlane.f32.xlu0 %v617_v17 }
 0x1b9   : > { %621 = vadd.xlane.f32.xlu1 %v620_v19 }
 0x1ca   : > { %687 = vperm.xlu1 %852, %v679_v20  }
 0x1cb   : > { %682 = vperm.xlu0 %851, %v678_v21  }
 0x23e   : > { %v645_v22 = vpop.xlane.xlu0 %644 }
 0x23f   : > { %v649_v23 = vmul.f32 0.03125, %v645_v22 }
 0x241   : > { %v651_v24 = vadd.f32 1e-05, %v649_v23 }
 0x242   : > { %v648_v25 = vpop.xlane.xlu1 %647  ;;  %v619_v33 = vpop.xlane.xlu0 %618 }
 0x243   : > { %892 = vrsqrt.f32 %v651_v24  ;;  %v650_v26 = vmul.f32 0.03125, %v648_v25  ;;  %v623_v35 = vmul.f32 0.03125, %v619_v33 }
 0x245   : > { %v652_v27 = vadd.f32 1e-05, %v650_v26  ;;  %v625_v39 = vadd.f32 1e-05, %v623_v35 }
 0x246   : > { %v622_v38 = vpop.xlane.xlu1 %621 }
 0x247   : > { %894 = vrsqrt.f32 %v652_v27  ;;  %v624_v40 = vmul.f32 0.03125, %v622_v38 }
 0x249   : > { %v626_v42 = vadd.f32 1e-05, %v624_v40 }
 0x24a   : > { %v683_v55 = vpop.permute.xlu0 %682  ;;  %v688_v57 = vpop.permute.xlu1 %687 }
 0x24d   : > { %v893_v28 = vpop.eup %892 }
 0x24e   : > { %v655_v29 = vmul.f32 %v893_v28, %v639_v7  ;;  %v705_v7 = vld [vmem:[%s231_s25] sm:$0x1] }
 0x250   : > { %v657_v30 = vsub.f32 0.0, %v655_v29 }
 0x251   : > { %v895_v31 = vpop.eup %894 }
 0x252   : > { %v659_v32 = vmul.f32 1.442695, %v657_v30  ;;  %v656_v34 = vmul.f32 %v895_v31, %v640_v12 }
 0x254   : > { %896 = vpow2.f32 %v659_v32  ;;  %v658_v36 = vsub.f32 0.0, %v656_v34 }
 0x256   : > { %v661_v37 = vmul.f32 1.442695, %v658_v36 }
 0x258   : > { %898 = vpow2.f32 %v661_v37 }
 0x259   : > { %900 = vrsqrt.f32 %v625_v39 }
 0x25e   : > { %v897_v41 = vpop.eup %896 }
 0x25f   : > { %v663_v43 = vadd.f32 1.0, %v897_v41 }
 0x261   : > { %902 = vrcp.f32 %v663_v43 }
 0x262   : > { %904 = vrsqrt.f32 %v626_v42  ;;  %v899_v44 = vpop.eup %898 }
 0x263   : > { %v664_v45 = vadd.f32 1.0, %v899_v44  ;;  %v901_v46 = vpop.eup %900 }
 0x264   : > { %v629_v47 = vmul.f32 %v901_v46, %v613_v5 }
 0x265   : > { %906 = vrcp.f32 %v664_v45 }
 0x26b   : > { %v903_v48 = vpop.eup %902 }
 0x26c   : > { %v905_v49 = vpop.eup %904  ;;  %v667_v50 = vmul.f32 %v903_v48, %v629_v47 }
 0x26d   : > { %v630_v53 = vmul.f32 %v905_v49, %v614_v11 }
 0x26e   : > { %v676_v52 = vmul.f32 %v808_v51, %v667_v50 }
 0x26f   : > { %v907_v54 = vpop.eup %906 }
 0x270   : > { %v668_v56 = vmul.f32 %v907_v54, %v630_v53  ;;  %v690_v58 = vmul.f32 %v683_v55, %v676_v52 }
 0x272   : > { %v677_v59 = vmul.f32 %v808_v51, %v668_v56  ;;  %v692_v61 = vsel %vm603_vm1, %v690_v58, 0.0 }
 0x274   : > { %v691_v60 = vmul.f32 %v688_v57, %v677_v59 }
 0x276   : > { %v693_v62 = vsel %vm603_vm1, %v691_v60, 0.0 }
 0x277   : > { %v694_v63 = vadd.f32 %v693_v62, %v692_v61 }
 0x279   : > { %695 = vadd.xlane.f32.xlu1 %v694_v63 }
 0x306   : > { %v696_v0 = vpop.xlane.xlu1 %695 }
 0x307   : > { %v697_v1 = vrot.slane %v696_v0, 4 }
 0x309   : > { %v698_v2 = vadd.f32 %v697_v1, %v696_v0 }
 0x30b   : > { %v699_v3 = vrot.slane %v698_v2, 2 }
 0x30d   : > { %v700_v4 = vadd.f32 %v699_v3, %v698_v2 }
 0x30f   : > { %v701_v5 = vrot.slane %v700_v4, 1 }
 0x311   : > { %v702_v6 = vadd.f32 %v701_v5, %v700_v4 }
 0x313   : > { %840 = vpush %v702_v6 }
 0x344   : > { %s841_s26 = spop %840 }
 0x345   : > { %v704_v8 = vstv %s841_s26 }
 0x346   : > { %v706_v9 = vadd.f32 %v705_v7, %v704_v8 }
 0x348   : > { %708 = vst.msk [vmem:[%s234_s29] sm:$0x1] %vm707_vm2, %v706_v9 }
 0x349 PF: > { %s15_s18 = sadd.s32 1, %s914_s18  }
 0x34a   : > { %p12_p4 = scmp.ge.s32.totalorder %s15_s18, 4  }
 0x34c   :  { %14 = sbr.rel (!%p12_p4) target bundleno = 1 (0x1), region = 73 }

</bundles_post_ra>
